<compile_context>
chip_gen: v7x
topology: tpu7x:2x2x1
jax: 0.10.0
libtpu: 0.0.40
codegen_flags: <defaults>
</compile_context>

<pallas_src>
import functools

import jax
import jax.numpy as jnp
import numpy as np
from jax.experimental import pallas as pl
from jax.experimental.pallas import tpu as pltpu

K_IN = 256       # lane-padded flattened image (7*7*3 = 147 real values)
N_C1 = 1024      # conv1 dense output: 4 pool quadrants x (9 cells x 16 ch = 144, pad 256)


# ---------------------------------------------------------------------------
# Fused Pallas kernel: conv1 -> maxpool -> conv2 -> conv3 -> actor/critic heads
# ---------------------------------------------------------------------------
def _acmodel_fused_kernel(x_ref, w1_ref, b1_ref, w2_ref, b2_ref, w3_ref, b3_ref,
                          wh1_ref, bh1_ref, wh2_ref, bh2_ref, o_ref, *, n_actions):
    f32 = jnp.float32
    cdt = w1_ref.dtype                         # MXU input dtype on the conv path

    x = x_ref[...]                             # (tb, 256) raw flattened image (zero padded)

    # conv1 + ReLU: one dense GEMM producing all 36 output positions at once.
    # Column layout: quadrant q (0..3, blocks of 256 lanes) x pooled-cell (0..8, 16 lanes)
    # x out-channel; lanes 144..255 of each quadrant block are zero.
    y1 = jnp.dot(x, w1_ref[...], preferred_element_type=f32) + b1_ref[...]
    y1 = jnp.maximum(y1, 0.0)                  # (tb, 1024) f32

    # 2x2 max-pool == elementwise max over the four vreg-aligned 256-lane quadrant blocks.
    pooled = jnp.maximum(jnp.maximum(y1[:, 0:256], y1[:, 256:512]),
                         jnp.maximum(y1[:, 512:768], y1[:, 768:1024]))
    pooled = pooled.astype(cdt)                # (tb, 256): cell*16 + ch, lanes >=144 zero

    # conv2 + ReLU: all 4 output positions in one zero-scattered K=256 GEMM.
    h2 = jnp.dot(pooled, w2_ref[...], preferred_element_type=f32) + b2_ref[...]
    h2 = jnp.maximum(h2, 0.0).astype(cdt)      # (tb, 128): pos*32 + ch

    # conv3 + ReLU: single 1x1x64 output position, K=128 GEMM == image embedding.
    emb = jnp.dot(h2, w3_ref[...], preferred_element_type=f32) + b3_ref[...]
    emb = jnp.maximum(emb, 0.0)                # (tb, 64) f32

    # Actor/critic heads, fused and kept in f32 end-to-end (tiny GEMMs, best numerics).
    t = jnp.tanh(jnp.dot(emb, wh1_ref[...], preferred_element_type=f32) + bh1_ref[...])
    raw = jnp.dot(t, wh2_ref[...], preferred_element_type=f32) + bh2_ref[...]  # [logits|value|0]

    lane = jax.lax.broadcasted_iota(jnp.int32, raw.shape, 1)
    amask = lane < n_actions                                    # actor-logit lanes
    m = jnp.max(jnp.where(amask, raw, -jnp.inf), axis=1, keepdims=True)
    shifted = raw - m
    sumexp = jnp.sum(jnp.where(amask, jnp.exp(shifted), 0.0), axis=1, keepdims=True)
    logp = shifted - jnp.log(sumexp)
    # lane-dense (tb, 128) slab: [log_probs | value | zeros]
    o_ref[...] = jnp.where(amask, logp, raw).astype(o_ref.dtype)


# ---------------------------------------------------------------------------
# Host-side parameter packing (done once, outside the hot path)
# ---------------------------------------------------------------------------
def pack_params(p, n_actions, compute_dtype=jnp.bfloat16):
    """Pack weights into the dense, zero-scattered layouts the kernel expects.

    compute_dtype: MXU input dtype for the conv path (bf16 on v6e/v7x; prefer f32 on v5e,
    whose VPU/EUP lack bf16 and whose MXU has huge headroom here).  Heads stay f32.
    """
    w1 = np.asarray(p["w1"], np.float32).reshape(2, 2, 3, 16)     # (kh, kw, cin, cout)
    b1 = np.asarray(p["b1"], np.float32).reshape(16)
    w2 = np.asarray(p["w2"], np.float32).reshape(2, 2, 16, 32)
    b2 = np.asarray(p["b2"], np.float32).reshape(32)

    # conv1 dense: rows = flattened image (h*7+w)*3 + cin (rows 147..255 zero),
    # cols = quadrant*256 + pooled_cell*16 + oc (lanes 144..255 of each quadrant zero).
    W1 = np.zeros((K_IN, N_C1), np.float32)
    B1 = np.zeros((1, N_C1), np.float32)
    for q in range(4):                       # pool quadrant (qy, qx)
        qy, qx = q // 2, q % 2
        for cell in range(9):                # pooled cell (y, x)
            y, x = cell // 3, cell % 3
            r, c = 2 * y + qy, 2 * x + qx    # conv1 output position feeding this quadrant
            col0 = q * 256 + cell * 16
            B1[0, col0:col0 + 16] = b1
            for dh in range(2):
                for dw in range(2):
                    h, w = r + dh, c + dw
                    for cin in range(3):
                        W1[(h * 7 + w) * 3 + cin, col0:col0 + 16] = w1[dh, dw, cin]

    # conv2 dense: rows = pooled-cell*16 + cin (rows 144..255 zero), cols = pos*32 + oc.
    W2 = np.zeros((256, 128), np.float32)
    B2 = np.zeros((1, 128), np.float32)
    for pos in range(4):                     # conv2 output position (i, j)
        i, j = pos // 2, pos % 2
        col0 = pos * 32
        B2[0, col0:col0 + 32] = b2
        for dh in range(2):
            for dw in range(2):
                row0 = ((i + dh) * 3 + (j + dw)) * 16
                W2[row0:row0 + 16, col0:col0 + 32] = w2[dh, dw]

    # heads layer 1: [actor | critic] -> one (64, 128) matmul.  Kept in f32.
    wh1 = jnp.concatenate([p["wa1"], p["wc1"]], axis=1)           # (64, 128)
    bh1 = jnp.concatenate([p["ba1"], p["bc1"]], axis=1)           # (1, 128)
    # heads layer 2: block-diagonal, lane-padded to 128 -> [logits | value | zeros].
    wh2 = jnp.zeros((128, 128), jnp.float32)
    wh2 = wh2.at[:64, :n_actions].set(p["wa2"])
    wh2 = wh2.at[64:, n_actions:n_actions + 1].set(p["wc2"])
    bh2 = jnp.zeros((1, 128), jnp.float32)
    bh2 = bh2.at[:, :n_actions].set(p["ba2"])
    bh2 = bh2.at[:, n_actions:n_actions + 1].set(p["bc2"])

    cast = lambda a: jnp.asarray(a, compute_dtype)
    return {"w1": cast(W1), "b1": jnp.asarray(B1),
            "w2": cast(W2), "b2": jnp.asarray(B2),
            "w3": cast(p["w3"]), "b3": jnp.asarray(p["b3"], jnp.float32),
            "wh1": jnp.asarray(wh1, jnp.float32), "bh1": jnp.asarray(bh1, jnp.float32),
            "wh2": wh2, "bh2": bh2}


# ---------------------------------------------------------------------------
# Tiling heuristic
# ---------------------------------------------------------------------------
def _round_up(x, m):
    return -(-x // m) * m


def _choose_tiling(B, batch_tile):
    n_tiles = -(-B // batch_tile)
    if n_tiles > 1 and n_tiles % 2 == 1:
        n_tiles += 1                      # even tile count keeps both v7x TCs busy
    tb = _round_up(-(-B // n_tiles), 16)  # multiple of 16: bf16 sublane-pack safe
    n_tiles = -(-B // tb)
    return tb, n_tiles


# ---------------------------------------------------------------------------
# Forward wrapper
# ---------------------------------------------------------------------------
def acmodel_forward(image, memory, kp, n_actions, *, batch_tile=512):
    """image: (B,7,7,3) f32 NHWC.  kp: pack_params(...).  Returns (log_probs, value, memory)."""
    B = image.shape[0]
    cdt = kp["w1"].dtype
    tb, n_tiles = _choose_tiling(B, batch_tile)
    Bp = n_tiles * tb

    # Raw image, flattened and lane-padded to 256: single pad materialization, no im2col.
    x = jnp.pad(image.reshape(B, 147).astype(cdt), ((0, Bp - B), (0, K_IN - 147)))

    wspec = lambda shp: pl.BlockSpec(shp, lambda i: (0, 0))       # resident weights/biases
    kernel = functools.partial(_acmodel_fused_kernel, n_actions=n_actions)

    slab = pl.pallas_call(
        kernel,
        out_shape=jax.ShapeDtypeStruct((Bp, 128), jnp.float32),
        grid_spec=pltpu.PrefetchScalarGridSpec(
            num_scalar_prefetch=0,
            grid=(n_tiles,),
            in_specs=[
                pl.BlockSpec((tb, K_IN), lambda i: (i, 0)),       # image tile (batch-tiled)
                wspec((K_IN, N_C1)), wspec((1, N_C1)),            # conv1 dense
                wspec((256, 128)), wspec((1, 128)),               # conv2 dense
                wspec((128, 64)), wspec((1, 64)),                 # conv3
                wspec((64, 128)), wspec((1, 128)),                # heads layer 1 (fused)
                wspec((128, 128)), wspec((1, 128)),               # heads layer 2 (block-diag)
            ],
            out_specs=pl.BlockSpec((tb, 128), lambda i: (i, 0)),  # lane-dense output slab
        ),
        compiler_params=pltpu.CompilerParams(dimension_semantics=("parallel",)),
    )(x, kp["w1"], kp["b1"], kp["w2"], kp["b2"], kp["w3"], kp["b3"],
      kp["wh1"], kp["bh1"], kp["wh2"], kp["bh2"])

    log_probs = slab[:B, :n_actions]
    value = slab[:B, n_actions]
    return log_probs, value, memory        # use_memory=False -> memory unchanged


# ---------------------------------------------------------------------------
# Parameter init (matches the module's custom Linear init; convs use a simple scheme)
# ---------------------------------------------------------------------------
def init_params(key, n_actions):
    ks = jax.random.split(key, 16)

    def conv_w(k, kh, kw, cin, cout):
        fan_in = kh * kw * cin
        w = jax.random.normal(k, (kh, kw, cin, cout), jnp.float32) / np.sqrt(fan_in)
        return w.reshape(kh * kw * cin, cout)

    def conv_b(k, fan_in, cout):
        bound = 1.0 / np.sqrt(fan_in)
        return jax.random.uniform(k, (1, cout), jnp.float32, -bound, bound)

    def linear_w(k, din, dout):
        # PyTorch init_params: normal(0,1), each output-unit row scaled to unit L2 norm.
        w = jax.random.normal(k, (din, dout), jnp.float32)
        return w / jnp.sqrt(jnp.sum(w * w, axis=0, keepdims=True))

    return {
        "w1": conv_w(ks[0], 2, 2, 3, 16),   "b1": conv_b(ks[1], 12, 16),
        "w2": conv_w(ks[2], 2, 2, 16, 32),  "b2": conv_b(ks[3], 64, 32),
        "w3": conv_w(ks[4], 2, 2, 32, 64),  "b3": conv_b(ks[5], 128, 64),
        "wa1": linear_w(ks[6], 64, 64),         "ba1": jnp.zeros((1, 64), jnp.float32),
        "wa2": linear_w(ks[7], 64, n_actions),  "ba2": jnp.zeros((1, n_actions), jnp.float32),
        "wc1": linear_w(ks[8], 64, 64),         "bc1": jnp.zeros((1, 64), jnp.float32),
        "wc2": linear_w(ks[9], 64, 1),          "bc2": jnp.zeros((1, 1), jnp.float32),
    }


# ---------------------------------------------------------------------------
# Pure-JAX reference (correctness check)
# ---------------------------------------------------------------------------
def im2col(x, kh, kw):
    B, H, W, C = x.shape
    Ho, Wo = H - kh + 1, W - kw + 1
    cols = [x[:, dh:dh + Ho, dw:dw + Wo, :] for dh in range(kh) for dw in range(kw)]
    return jnp.concatenate(cols, axis=-1).reshape(B * Ho * Wo, kh * kw * C)


def ref_forward(image, p, n_actions):
    B = image.shape[0]
    h1 = jnp.maximum(im2col(image, 2, 2) @ p["w1"] + p["b1"], 0.0).reshape(B, 6, 6, 16)
    pooled = jnp.maximum(jnp.maximum(h1[:, 0::2, 0::2], h1[:, 0::2, 1::2]),
                         jnp.maximum(h1[:, 1::2, 0::2], h1[:, 1::2, 1::2]))
    h2 = jnp.maximum(im2col(pooled, 2, 2) @ p["w2"] + p["b2"], 0.0)
    emb = jnp.maximum(h2.reshape(B, 128) @ p["w3"] + p["b3"], 0.0)
    logits = jnp.tanh(emb @ p["wa1"] + p["ba1"]) @ p["wa2"] + p["ba2"]
    logp = jax.nn.log_softmax(logits, axis=1)
    value = (jnp.tanh(emb @ p["wc1"] + p["bc1"]) @ p["wc2"] + p["bc2"])[:, 0]
    return logp, value


# ---------------------------------------------------------------------------
if __name__ == "__main__":
    B, H, W, C = 2, 7, 7, 3          # obs_space['image'] = (7, 7, 3)
    N_ACTIONS = 7                    # action_space.n
    IMG_EMB = ((H - 1) // 2 - 2) * ((W - 1) // 2 - 2) * 64   # = 64

    key = jax.random.PRNGKey(0)
    k_img, k_par, k_img2 = jax.random.split(key, 3)
    image = jax.random.uniform(k_img, (B, H, W, C), jnp.float32)
    memory = jnp.zeros((B, 2 * IMG_EMB), jnp.float32)        # unused (use_memory=False)
    params = init_params(k_par, N_ACTIONS)

    ref_logp, ref_value = ref_forward(image, params, N_ACTIONS)

    # f32 path (recommended on v5e): tight check against the pure-JAX reference.
    kp32 = pack_params(params, N_ACTIONS, jnp.float32)
    logp32, value32, mem_out = acmodel_forward(image, memory, kp32, N_ACTIONS)
    jax.block_until_ready((logp32, value32, mem_out))
    assert np.allclose(np.asarray(logp32), np.asarray(ref_logp), atol=2e-3, rtol=2e-3)
    assert np.allclose(np.asarray(value32), np.asarray(ref_value), atol=2e-3, rtol=2e-3)
    assert mem_out.shape == memory.shape

    # bf16 conv path (v6e/v7x default): f32 accumulation, f32 heads & epilogues.
    kpbf = pack_params(params, N_ACTIONS, jnp.bfloat16)
    logp, value, _ = acmodel_forward(image, memory, kpbf, N_ACTIONS)
    jax.block_until_ready((logp, value))
    assert np.allclose(np.asarray(logp), np.asarray(ref_logp), atol=5e-2, rtol=1e-1)
    assert np.allclose(np.asarray(value), np.asarray(ref_value), atol=5e-2, rtol=1e-1)
    assert np.allclose(np.asarray(jnp.exp(logp)).sum(axis=1), 1.0, atol=1e-3)

    # Multi-tile batch grid (pipelined DMA, even tile count, batch padded to tile multiple).
    B2 = 600
    image2 = jax.random.uniform(k_img2, (B2, H, W, C), jnp.float32)
    memory2 = jnp.zeros((B2, 2 * IMG_EMB), jnp.float32)
    logp2, value2, _ = acmodel_forward(image2, memory2, kpbf, N_ACTIONS, batch_tile=256)
    jax.block_until_ready((logp2, value2))
    ref_logp2, ref_value2 = ref_forward(image2, params, N_ACTIONS)
    assert np.allclose(np.asarray(logp2), np.asarray(ref_logp2), atol=5e-2, rtol=1e-1)
    assert np.allclose(np.asarray(value2), np.asarray(ref_value2), atol=5e-2, rtol=1e-1)

    # TODO(synk): use_memory (LSTMCell) and use_text (Embedding+GRU) branches are
    # disabled by default in the reference module and are not implemented here.
    print("KERNEL_OK")
</pallas_src>

<mosaic_0001>
module attributes {stable_mosaic.version = 11 : i64} {
  func.func @_acmodel_fused_kernel(%arg0: i32, %arg1: memref<16x256xf32, #tpu.memory_space<vmem>>, %arg2: memref<256x1024xf32, #tpu.memory_space<vmem>>, %arg3: memref<1x1024xf32, #tpu.memory_space<vmem>>, %arg4: memref<256x128xf32, #tpu.memory_space<vmem>>, %arg5: memref<1x128xf32, #tpu.memory_space<vmem>>, %arg6: memref<128x64xf32, #tpu.memory_space<vmem>>, %arg7: memref<1x64xf32, #tpu.memory_space<vmem>>, %arg8: memref<64x128xf32, #tpu.memory_space<vmem>>, %arg9: memref<1x128xf32, #tpu.memory_space<vmem>>, %arg10: memref<128x128xf32, #tpu.memory_space<vmem>>, %arg11: memref<1x128xf32, #tpu.memory_space<vmem>>, %arg12: memref<16x128xf32, #tpu.memory_space<vmem>>) attributes {dimension_semantics = [#tpu.dimension_semantics<parallel>], iteration_bounds = array<i64: 1>, scalar_prefetch = 0 : i64, scratch_operands = 0 : i64, tpu.core_type = #tpu.core_type<tc>, window_params = [{transform_indices = @transform_0, window_bounds = array<i64: 16, 256>}, {pipeline_mode = #tpu.pipeline_mode<synchronous>, transform_indices = @transform_1, window_bounds = array<i64: 256, 1024>}, {pipeline_mode = #tpu.pipeline_mode<synchronous>, transform_indices = @transform_2, window_bounds = array<i64: 1, 1024>}, {pipeline_mode = #tpu.pipeline_mode<synchronous>, transform_indices = @transform_3, window_bounds = array<i64: 256, 128>}, {pipeline_mode = #tpu.pipeline_mode<synchronous>, transform_indices = @transform_4, window_bounds = array<i64: 1, 128>}, {pipeline_mode = #tpu.pipeline_mode<synchronous>, transform_indices = @transform_5, window_bounds = array<i64: 128, 64>}, {pipeline_mode = #tpu.pipeline_mode<synchronous>, transform_indices = @transform_6, window_bounds = array<i64: 1, 64>}, {pipeline_mode = #tpu.pipeline_mode<synchronous>, transform_indices = @transform_7, window_bounds = array<i64: 64, 128>}, {pipeline_mode = #tpu.pipeline_mode<synchronous>, transform_indices = @transform_8, window_bounds = array<i64: 1, 128>}, {pipeline_mode = #tpu.pipeline_mode<synchronous>, transform_indices = @transform_9, window_bounds = array<i64: 128, 128>}, {pipeline_mode = #tpu.pipeline_mode<synchronous>, transform_indices = @transform_10, window_bounds = array<i64: 1, 128>}, {transform_indices = @transform_11, window_bounds = array<i64: 16, 128>}]} {
    %c0 = arith.constant 0 : index
    %c0_0 = arith.constant 0 : index
    %0 = vector.load %arg1[%c0, %c0_0] : memref<16x256xf32, #tpu.memory_space<vmem>>, vector<16x256xf32>
    %c0_1 = arith.constant 0 : index
    %c0_2 = arith.constant 0 : index
    %1 = vector.load %arg2[%c0_1, %c0_2] : memref<256x1024xf32, #tpu.memory_space<vmem>>, vector<256x1024xf32>
    %cst = arith.constant dense<0.000000e+00> : vector<16x1024xf32>
    %2 = tpu.matmul %0, %1, %cst {dimension_numbers = #tpu.dot_dimension_numbers<[1], [0], [0], [1], [0, 0, 1, 1], [], []>} : vector<16x256xf32>, vector<256x1024xf32>, vector<16x1024xf32> -> vector<16x1024xf32>
    %c0_3 = arith.constant 0 : index
    %c0_4 = arith.constant 0 : index
    %3 = vector.load %arg3[%c0_3, %c0_4] : memref<1x1024xf32, #tpu.memory_space<vmem>>, vector<1x1024xf32>
    %4 = vector.broadcast %3 : vector<1x1024xf32> to vector<16x1024xf32>
    %5 = arith.addf %2, %4 : vector<16x1024xf32>
    %cst_5 = arith.constant 0.000000e+00 : f32
    %6 = vector.broadcast %cst_5 : f32 to vector<16x1024xf32>
    %7 = arith.maximumf %5, %6 : vector<16x1024xf32>
    %8 = vector.extract_strided_slice %7 {offsets = [0, 0], sizes = [16, 256], strides = [1, 1]} : vector<16x1024xf32> to vector<16x256xf32>
    %9 = vector.extract_strided_slice %7 {offsets = [0, 256], sizes = [16, 256], strides = [1, 1]} : vector<16x1024xf32> to vector<16x256xf32>
    %10 = arith.maximumf %8, %9 : vector<16x256xf32>
    %11 = vector.extract_strided_slice %7 {offsets = [0, 512], sizes = [16, 256], strides = [1, 1]} : vector<16x1024xf32> to vector<16x256xf32>
    %12 = vector.extract_strided_slice %7 {offsets = [0, 768], sizes = [16, 256], strides = [1, 1]} : vector<16x1024xf32> to vector<16x256xf32>
    %13 = arith.maximumf %11, %12 : vector<16x256xf32>
    %14 = arith.maximumf %10, %13 : vector<16x256xf32>
    %c0_6 = arith.constant 0 : index
    %c0_7 = arith.constant 0 : index
    %15 = vector.load %arg4[%c0_6, %c0_7] : memref<256x128xf32, #tpu.memory_space<vmem>>, vector<256x128xf32>
    %cst_8 = arith.constant dense<0.000000e+00> : vector<16x128xf32>
    %16 = tpu.matmul %14, %15, %cst_8 {dimension_numbers = #tpu.dot_dimension_numbers<[1], [0], [0], [1], [0, 0, 1, 1], [], []>} : vector<16x256xf32>, vector<256x128xf32>, vector<16x128xf32> -> vector<16x128xf32>
    %c0_9 = arith.constant 0 : index
    %c0_10 = arith.constant 0 : index
    %17 = vector.load %arg5[%c0_9, %c0_10] : memref<1x128xf32, #tpu.memory_space<vmem>>, vector<1x128xf32>
    %18 = vector.broadcast %17 : vector<1x128xf32> to vector<16x128xf32>
    %19 = arith.addf %16, %18 : vector<16x128xf32>
    %cst_11 = arith.constant 0.000000e+00 : f32
    %20 = vector.broadcast %cst_11 : f32 to vector<16x128xf32>
    %21 = arith.maximumf %19, %20 : vector<16x128xf32>
    %c0_12 = arith.constant 0 : index
    %c0_13 = arith.constant 0 : index
    %22 = vector.load %arg6[%c0_12, %c0_13] : memref<128x64xf32, #tpu.memory_space<vmem>>, vector<128x64xf32>
    %cst_14 = arith.constant dense<0.000000e+00> : vector<16x64xf32>
    %23 = tpu.matmul %21, %22, %cst_14 {dimension_numbers = #tpu.dot_dimension_numbers<[1], [0], [0], [1], [0, 0, 1, 1], [], []>} : vector<16x128xf32>, vector<128x64xf32>, vector<16x64xf32> -> vector<16x64xf32>
    %c0_15 = arith.constant 0 : index
    %c0_16 = arith.constant 0 : index
    %24 = vector.load %arg7[%c0_15, %c0_16] : memref<1x64xf32, #tpu.memory_space<vmem>>, vector<1x64xf32>
    %25 = vector.broadcast %24 : vector<1x64xf32> to vector<16x64xf32>
    %26 = arith.addf %23, %25 : vector<16x64xf32>
    %cst_17 = arith.constant 0.000000e+00 : f32
    %27 = vector.broadcast %cst_17 : f32 to vector<16x64xf32>
    %28 = arith.maximumf %26, %27 : vector<16x64xf32>
    %c0_18 = arith.constant 0 : index
    %c0_19 = arith.constant 0 : index
    %29 = vector.load %arg8[%c0_18, %c0_19] : memref<64x128xf32, #tpu.memory_space<vmem>>, vector<64x128xf32>
    %cst_20 = arith.constant dense<0.000000e+00> : vector<16x128xf32>
    %30 = tpu.matmul %28, %29, %cst_20 {dimension_numbers = #tpu.dot_dimension_numbers<[1], [0], [0], [1], [0, 0, 1, 1], [], []>} : vector<16x64xf32>, vector<64x128xf32>, vector<16x128xf32> -> vector<16x128xf32>
    %c0_21 = arith.constant 0 : index
    %c0_22 = arith.constant 0 : index
    %31 = vector.load %arg9[%c0_21, %c0_22] : memref<1x128xf32, #tpu.memory_space<vmem>>, vector<1x128xf32>
    %32 = vector.broadcast %31 : vector<1x128xf32> to vector<16x128xf32>
    %33 = arith.addf %30, %32 : vector<16x128xf32>
    %34 = math.tanh %33 : vector<16x128xf32>
    %c0_23 = arith.constant 0 : index
    %c0_24 = arith.constant 0 : index
    %35 = vector.load %arg10[%c0_23, %c0_24] : memref<128x128xf32, #tpu.memory_space<vmem>>, vector<128x128xf32>
    %cst_25 = arith.constant dense<0.000000e+00> : vector<16x128xf32>
    %36 = tpu.matmul %34, %35, %cst_25 {dimension_numbers = #tpu.dot_dimension_numbers<[1], [0], [0], [1], [0, 0, 1, 1], [], []>} : vector<16x128xf32>, vector<128x128xf32>, vector<16x128xf32> -> vector<16x128xf32>
    %c0_26 = arith.constant 0 : index
    %c0_27 = arith.constant 0 : index
    %37 = vector.load %arg11[%c0_26, %c0_27] : memref<1x128xf32, #tpu.memory_space<vmem>>, vector<1x128xf32>
    %38 = vector.broadcast %37 : vector<1x128xf32> to vector<16x128xf32>
    %39 = arith.addf %36, %38 : vector<16x128xf32>
    %40 = tpu.iota {dimensions = array<i32: 1>} : vector<16x128xi32>
    %c7_i32 = arith.constant 7 : i32
    %41 = vector.broadcast %c7_i32 : i32 to vector<16x128xi32>
    %42 = arith.cmpi slt, %40, %41 : vector<16x128xi32>
    %cst_28 = arith.constant 0xFF800000 : f32
    %43 = vector.broadcast %cst_28 : f32 to vector<16x128xf32>
    %44 = arith.select %42, %39, %43 : vector<16x128xi1>, vector<16x128xf32>
    %cst_29 = arith.constant dense<0xFF800000> : vector<16xf32>
    %45 = vector.multi_reduction <maximumf>, %44, %cst_29 [1] : vector<16x128xf32> to vector<16xf32>
    %46 = vector.shape_cast %45 : vector<16xf32> to vector<16x1xf32>
    %47 = vector.broadcast %46 : vector<16x1xf32> to vector<16x128xf32>
    %48 = arith.subf %39, %47 : vector<16x128xf32>
    %49 = math.exp %48 : vector<16x128xf32>
    %cst_30 = arith.constant 0.000000e+00 : f32
    %50 = vector.broadcast %cst_30 : f32 to vector<16x128xf32>
    %51 = arith.select %42, %49, %50 : vector<16x128xi1>, vector<16x128xf32>
    %cst_31 = arith.constant dense<0.000000e+00> : vector<16xf32>
    %52 = vector.multi_reduction <add>, %51, %cst_31 [1] : vector<16x128xf32> to vector<16xf32>
    %53 = vector.shape_cast %52 : vector<16xf32> to vector<16x1xf32>
    %54 = math.log %53 : vector<16x1xf32>
    %55 = vector.broadcast %54 : vector<16x1xf32> to vector<16x128xf32>
    %56 = arith.subf %48, %55 : vector<16x128xf32>
    %57 = arith.select %42, %56, %39 : vector<16x128xi1>, vector<16x128xf32>
    %c0_32 = arith.constant 0 : index
    %c0_33 = arith.constant 0 : index
    %58 = vector.load %arg12[%c0_32, %c0_33] : memref<16x128xf32, #tpu.memory_space<vmem>>, vector<16x128xf32>
    tpu.vector_store %arg12[%c0_32, %c0_33], %57 {strides = array<i32>} : memref<16x128xf32, #tpu.memory_space<vmem>>, vector<16x128xf32>,
    return
  }
  func.func @transform_0(%arg0: i32) -> (i32, i32) {
    %c0_i32 = arith.constant 0 : i32
    %c0_i32_0 = arith.constant 0 : i32
    return %arg0, %c0_i32 : i32, i32
  }
  func.func @transform_1(%arg0: i32) -> (i32, i32) {
    %c0_i32 = arith.constant 0 : i32
    %c0_i32_0 = arith.constant 0 : i32
    %c0_i32_1 = arith.constant 0 : i32
    return %c0_i32, %c0_i32_0 : i32, i32
  }
  func.func @transform_2(%arg0: i32) -> (i32, i32) {
    %c0_i32 = arith.constant 0 : i32
    %c0_i32_0 = arith.constant 0 : i32
    %c0_i32_1 = arith.constant 0 : i32
    return %c0_i32, %c0_i32_0 : i32, i32
  }
  func.func @transform_3(%arg0: i32) -> (i32, i32) {
    %c0_i32 = arith.constant 0 : i32
    %c0_i32_0 = arith.constant 0 : i32
    %c0_i32_1 = arith.constant 0 : i32
    return %c0_i32, %c0_i32_0 : i32, i32
  }
  func.func @transform_4(%arg0: i32) -> (i32, i32) {
    %c0_i32 = arith.constant 0 : i32
    %c0_i32_0 = arith.constant 0 : i32
    %c0_i32_1 = arith.constant 0 : i32
    return %c0_i32, %c0_i32_0 : i32, i32
  }
  func.func @transform_5(%arg0: i32) -> (i32, i32) {
    %c0_i32 = arith.constant 0 : i32
    %c0_i32_0 = arith.constant 0 : i32
    %c0_i32_1 = arith.constant 0 : i32
    return %c0_i32, %c0_i32_0 : i32, i32
  }
  func.func @transform_6(%arg0: i32) -> (i32, i32) {
    %c0_i32 = arith.constant 0 : i32
    %c0_i32_0 = arith.constant 0 : i32
    %c0_i32_1 = arith.constant 0 : i32
    return %c0_i32, %c0_i32_0 : i32, i32
  }
  func.func @transform_7(%arg0: i32) -> (i32, i32) {
    %c0_i32 = arith.constant 0 : i32
    %c0_i32_0 = arith.constant 0 : i32
    %c0_i32_1 = arith.constant 0 : i32
    return %c0_i32, %c0_i32_0 : i32, i32
  }
  func.func @transform_8(%arg0: i32) -> (i32, i32) {
    %c0_i32 = arith.constant 0 : i32
    %c0_i32_0 = arith.constant 0 : i32
    %c0_i32_1 = arith.constant 0 : i32
    return %c0_i32, %c0_i32_0 : i32, i32
  }
  func.func @transform_9(%arg0: i32) -> (i32, i32) {
    %c0_i32 = arith.constant 0 : i32
    %c0_i32_0 = arith.constant 0 : i32
    %c0_i32_1 = arith.constant 0 : i32
    return %c0_i32, %c0_i32_0 : i32, i32
  }
  func.func @transform_10(%arg0: i32) -> (i32, i32) {
    %c0_i32 = arith.constant 0 : i32
    %c0_i32_0 = arith.constant 0 : i32
    %c0_i32_1 = arith.constant 0 : i32
    return %c0_i32, %c0_i32_0 : i32, i32
  }
  func.func @transform_11(%arg0: i32) -> (i32, i32) {
    %c0_i32 = arith.constant 0 : i32
    %c0_i32_0 = arith.constant 0 : i32
    return %arg0, %c0_i32 : i32, i32
  }
}

</mosaic_0001>

<bundles_post_ra>
// kernel: tpu_custom_call.1
= control target key start
LH: loop header
LB: loop body
LE: loop exit
PB: predicated region body
PF: predicated region fallthrough
CT: control target
= control target key end

     0   :  { %16 = vsyncpa [#allocation3], 0  ;;  %s2192_s0 = inlined_call_operand.vmem [shape: f32[16,256], index: 0, kind: input, shape index: {}]   ;;  %s2193_s1 = inlined_call_operand.hbm [shape: f32[256,1024], index: 1, kind: input, shape index: {}]   ;;  %s2194_s2 = inlined_call_operand.hbm [shape: f32[1,1024], index: 2, kind: input, shape index: {}]   ;;  %s2195_s3 = inlined_call_operand.hbm [shape: f32[256,128], index: 3, kind: input, shape index: {}]   ;;  %s2196_s4 = inlined_call_operand.vmem [shape: f32[1,128], index: 4, kind: input, shape index: {}]   ;;  %s2197_s5 = inlined_call_operand.vmem [shape: f32[128,64], index: 5, kind: input, shape index: {}]   ;;  %s2198_s6 = inlined_call_operand.vmem [shape: f32[1,64], index: 6, kind: input, shape index: {}]   ;;  %s2199_s7 = inlined_call_operand.vmem [shape: f32[64,128], index: 7, kind: input, shape index: {}]   ;;  %s2200_s8 = inlined_call_operand.hbm [shape: f32[1,128], index: 8, kind: input, shape index: {}]   ;;  %s2201_s9 = inlined_call_operand.vmem [shape: f32[128,128], index: 9, kind: input, shape index: {}]   ;;  %s2202_s10 = inlined_call_operand.vmem [shape: f32[1,128], index: 10, kind: input, shape index: {}]   ;;  %s2203_s11 = inlined_call_operand.hbm [shape: f32[16,128], index: 11, kind: output, shape index: {}]  }
   0x1   :  { %17 = vsyncpa [#allocation6], 0 }
   0x2   :  { %18 = vsyncpa [#allocation9], 0 }
   0x3   :  { %19 = vsyncpa [#allocation4], 0  ;;  %s1877_s17 = smov [#allocation5]   ;;  %s1878_s19 = smov [#allocation2]  }
   0x4   :  { %s40_s18 = sshll.u32 %s1877_s17, 4  ;;  %s27_s20 = sshll.u32 %s1878_s19, 4  ;;  %s41_s18 = int_to_ptr.vmem [resolvable:$true] %s40_s18  ;;  %s1946_s20 = int_to_ptr.vmem [resolvable:$true] %s27_s20 }
   0x5   :  { %s1759_s23 = scalar_lea.hbm %s2194_s2, 128 }
   0x6   :  { %p1760_p0 = scmp.ne.s32.totalorder %s2194_s2, %s1759_s23  ;;  %p1763_p1 = scmp.lt.u32.totalorder %s1759_s23, %s2194_s2 }
   0x8   :  { %p1765_p2 = pnand %p1763_p1, %p1760_p0 }
   0xa   :  { %1768 = shalt.err (!%p1765_p2)
}
   0xb   :  { %s1769_s28 = scalar_lea.vmem %s41_s18, 128  ;;  %p1774_p4 = scmp.lt.s32.totalorder %s41_s18, %s41_s18 }
   0xc   :  { %p1770_p3 = scmp.ne.s32.totalorder %s41_s18, %s1769_s28  ;;  %p1775_p5 = scmp.lt.s32.totalorder %s1769_s28, %s1769_s28 }
   0xe   :  { %p1776_p6 = por %p1775_p5, %p1774_p4 }
  0x10   :  { %p1777_p7 = pnand %p1776_p6, %p1770_p3 }
  0x12   :  { %1780 = shalt.err (!%p1777_p7)
}
  0x13   :  { %43 = dma.hbm_to_vmem [thread:$0]  %s2194_s2, 128, %s41_s18, [#allocation6]  }
  0x14   :  { %s1781_s14 = scalar_lea.hbm %s2193_s1, 32768 }
  0x15   :  { %p1782_p8 = scmp.ne.s32.totalorder %s2193_s1, %s1781_s14  ;;  %p1785_p9 = scmp.lt.u32.totalorder %s1781_s14, %s2193_s1 }
  0x17   :  { %p1787_p10 = pnand %p1785_p9, %p1782_p8 }
  0x19   :  { %1790 = shalt.err (!%p1787_p10)
}
  0x1a   :  { %s1791_s21 = scalar_lea.vmem %s1946_s20, 32768  ;;  %p1796_p12 = scmp.lt.s32.totalorder %s1946_s20, %s1946_s20 }
  0x1b   :  { %p1792_p11 = scmp.ne.s32.totalorder %s1946_s20, %s1791_s21  ;;  %p1797_p13 = scmp.lt.s32.totalorder %s1791_s21, %s1791_s21 }
  0x1d   :  { %p1798_p0 = por %p1797_p13, %p1796_p12 }
  0x1f   :  { %p1799_p1 = pnand %p1798_p0, %p1792_p11 }
  0x21   :  { %1802 = shalt.err (!%p1799_p1)
}
  0x22   :  { %s1879_s2 = smov 1024   ;;  %s1880_s18 = smov 64  }
  0x23   :  { %33 = dma.hbm_to_vmem [thread:$0]  %s2193_s1, 32768, %s1946_s20, [#allocation3], %s1879_s2, %s1879_s2, %s1880_s18  }
  0x24   :  { %s1881_s24 = smov [#allocation7]   ;;  %s1803_s28 = scalar_lea.hbm %s2195_s3, 4096 }
  0x25   :  { %s49_s25 = sshll.u32 %s1881_s24, 4  ;;  %p1804_p2 = scmp.ne.s32.totalorder %s2195_s3, %s1803_s28  ;;  %s50_s25 = int_to_ptr.vmem [resolvable:$true] %s49_s25 }
  0x26   :  { %p1807_p3 = scmp.lt.u32.totalorder %s1803_s28, %s2195_s3 }
  0x28   :  { %p1809_p4 = pnand %p1807_p3, %p1804_p2 }
  0x2a   :  { %1812 = shalt.err (!%p1809_p4)
}
  0x2b   :  { %s1813_s14 = scalar_lea.vmem %s50_s25, 4096  ;;  %p1818_p6 = scmp.lt.s32.totalorder %s50_s25, %s50_s25 }
  0x2c   :  { %p1814_p5 = scmp.ne.s32.totalorder %s50_s25, %s1813_s14  ;;  %p1819_p7 = scmp.lt.s32.totalorder %s1813_s14, %s1813_s14 }
  0x2e   :  { %p1820_p8 = por %p1819_p7, %p1818_p6 }
  0x30   :  { %p1821_p9 = pnand %p1820_p8, %p1814_p5 }
  0x32   :  { %1824 = shalt.err (!%p1821_p9)
}
  0x33   :  { %s1882_s1 = smov 128   ;;  %s1883_s20 = smov 8  }
  0x34   :  { %55 = dma.hbm_to_vmem [thread:$0]  %s2195_s3, 4096, %s50_s25, [#allocation6], %s1882_s1, %s1882_s1, %s1883_s20  }
  0x35   :  { %s1884_s17 = smov [#allocation8]   ;;  %s1825_s18 = scalar_lea.hbm %s2200_s8, 16 }
  0x36   :  { %s70_s19 = sshll.u32 %s1884_s17, 4  ;;  %p1826_p10 = scmp.ne.s32.totalorder %s2200_s8, %s1825_s18  ;;  %s71_s19 = int_to_ptr.vmem [resolvable:$true] %s70_s19 }
  0x37   :  { %p1829_p11 = scmp.lt.u32.totalorder %s1825_s18, %s2200_s8 }
  0x39   :  { %p1831_p12 = pnand %p1829_p11, %p1826_p10 }
  0x3b   :  { %1834 = shalt.err (!%p1831_p12)
}
  0x3c   :  { %s1835_s27 = scalar_lea.vmem %s71_s19, 16  ;;  %s1839_s3 = scalar_lea.vmem %s71_s19, 32 }
  0x3d   :  { %p1836_p13 = scmp.ne.s32.totalorder %s71_s19, %s1835_s27  ;;  %p1840_p0 = scmp.lt.s32.totalorder %s71_s19, %s71_s19 }
  0x3e   :  { %p1841_p1 = scmp.lt.s32.totalorder %s1839_s3, %s1835_s27 }
  0x40   :  { %p1842_p2 = por %p1841_p1, %p1840_p0 }
  0x42   :  { %p1843_p3 = pnand %p1842_p2, %p1836_p13 }
  0x44   :  { %1846 = shalt.err (!%p1843_p3)
}
  0x45   :  { %73 = dma.hbm_to_vmem [thread:$0]  %s2200_s8, 16, %s71_s19, [#allocation9]  }
  0x46   :  { %1869 = dma.done.wait [#allocation3], 32768  }
  0x47   :  { %1870 = vsyncadd [#allocation3], 4294934528 }
  0x48   :  { %1871 = dma.done.wait [#allocation6], 4224  }
  0x49   :  { %1872 = vsyncadd [#allocation6], 4294963072 }
  0x4a   :  { %1873 = dma.done.wait [#allocation9], 16  }
  0x4b   :  { %1874 = vsyncadd [#allocation9], 4294967280  ;;  %v95_v0 = vld [vmem:[#allocation2 + $0x8] sm:$0xff]  ;;  %v97_v2 = vld [vmem:[#allocation2 + $0x18] sm:$0xff]  ;;  %vm959_vm0 = vcmask 523264  }
  0x4c   :  { %v103_v1 = vld [vmem:[#allocation2 + $0x48] sm:$0xff]  ;;  %v105_v4 = vld [vmem:[#allocation2 + $0x58] sm:$0xff]  ;;  %v94_v5 = vld [vmem:[#allocation2] sm:$0xff] }
  0x4d   :  { %v1370_v3 = vpack.c.bf16 %v103_v1, %v95_v0  ;;  %v102_v6 = vld [vmem:[#allocation2 + $0x40] sm:$0xff]  ;;  %v1434_v7 = vpack.c.bf16 %v105_v4, %v97_v2  ;;  %v96_v9 = vld [vmem:[#allocation2 + $0x10] sm:$0xff]  ;;  %v111_v11 = vld [vmem:[#allocation2 + $0x88] sm:$0xff] }
  0x4e   :  { %v1372_v8 = vpack.c.bf16 %v102_v6, %v94_v5  ;;  %v104_v10 = vld [vmem:[#allocation2 + $0x50] sm:$0xff]  ;;  %v119_v13 = vld [vmem:[#allocation2 + $0xc8] sm:$0xff]  ;;  %v113_v14 = vld [vmem:[#allocation2 + $0x98] sm:$0xff] }
  0x4f   :  { %1371 = vmatprep.subr.bf16.mxu0 %v1370_v3  ;;  %v1436_v12 = vpack.c.bf16 %v104_v10, %v96_v9  ;;  %v121_v15 = vld [vmem:[#allocation2 + $0xd8] sm:$0xff]  ;;  %1435 = vmatprep.subr.bf16.mxu1 %v1434_v7  ;;  %v1374_v16 = vpack.c.bf16 %v119_v13, %v111_v11  ;;  %v110_v18 = vld [vmem:[#allocation2 + $0x80] sm:$0xff]  ;;  %v112_v20 = vld [vmem:[#allocation2 + $0x90] sm:$0xff] }
  0x50   :  { %1373 = vmatpush1.bf16.msra.mxu0 %v1372_v8  ;;  %v1438_v17 = vpack.c.bf16 %v121_v15, %v113_v14  ;;  %v118_v19 = vld [vmem:[#allocation2 + $0xc0] sm:$0xff]  ;;  %v120_v22 = vld [vmem:[#allocation2 + $0xd0] sm:$0xff]  ;;  %v127_v23 = vld [vmem:[#allocation2 + $0x108] sm:$0xff] }
  0x51   :  { %1437 = vmatpush1.bf16.msra.mxu1 %v1436_v12  ;;  %v1376_v21 = vpack.c.bf16 %v118_v19, %v110_v18  ;;  %v135_v24 = vld [vmem:[#allocation2 + $0x148] sm:$0xff]  ;;  %1375 = vmatprep.subr.bf16.mxu0 %v1374_v16  ;;  %v1440_v25 = vpack.c.bf16 %v120_v22, %v112_v20  ;;  %v129_v27 = vld [vmem:[#allocation2 + $0x118] sm:$0xff]  ;;  %v126_v29 = vld [vmem:[#allocation2 + $0x100] sm:$0xff] }
  0x52   :  { %1439 = vmatprep.subr.bf16.mxu1 %v1438_v17  ;;  %v1378_v26 = vpack.c.bf16 %v135_v24, %v127_v23  ;;  %v137_v28 = vld [vmem:[#allocation2 + $0x158] sm:$0xff]  ;;  %v134_v31 = vld [vmem:[#allocation2 + $0x140] sm:$0xff]  ;;  %v128_v32 = vld [vmem:[#allocation2 + $0x110] sm:$0xff] }
  0x53   :  { %v1442_v30 = vpack.c.bf16 %v137_v28, %v129_v27  ;;  %v136_v33 = vld [vmem:[#allocation2 + $0x150] sm:$0xff]  ;;  %v1380_v34 = vpack.c.bf16 %v134_v31, %v126_v29  ;;  %v143_v35 = vld [vmem:[#allocation2 + $0x188] sm:$0xff]  ;;  %v145_v37 = vld [vmem:[#allocation2 + $0x198] sm:$0xff] }
  0x54   :  { %1377 = vmatpush1.bf16.msra.mxu0 %v1376_v21  ;;  %v151_v36 = vld [vmem:[#allocation2 + $0x1c8] sm:$0xff]  ;;  %v1444_v38 = vpack.c.bf16 %v136_v33, %v128_v32  ;;  %v153_v40 = vld [vmem:[#allocation2 + $0x1d8] sm:$0xff]  ;;  %v142_v41 = vld [vmem:[#allocation2 + $0x180] sm:$0xff] }
  0x55   :  { %1441 = vmatpush1.bf16.msra.mxu1 %v1440_v25  ;;  %1379 = vmatprep.subr.bf16.mxu0 %v1378_v26  ;;  %v1382_v39 = vpack.c.bf16 %v151_v36, %v143_v35  ;;  %v150_v42 = vld [vmem:[#allocation2 + $0x1c0] sm:$0xff]  ;;  %v1446_v43 = vpack.c.bf16 %v153_v40, %v145_v37  ;;  %v144_v44 = vld [vmem:[#allocation2 + $0x190] sm:$0xff]  ;;  %v159_v46 = vld [vmem:[#allocation2 + $0x208] sm:$0xff] }
  0x56   :  { %1443 = vmatprep.subr.bf16.mxu1 %v1442_v30  ;;  %v152_v45 = vld [vmem:[#allocation2 + $0x1d0] sm:$0xff]  ;;  %v167_v47 = vld [vmem:[#allocation2 + $0x248] sm:$0xff]  ;;  %v161_v48 = vld [vmem:[#allocation2 + $0x218] sm:$0xff]  ;;  %v1384_v50 = vpack.c.bf16 %v150_v42, %v142_v41 }
  0x57   :  { %v169_v49 = vld [vmem:[#allocation2 + $0x258] sm:$0xff]  ;;  %v1448_v51 = vpack.c.bf16 %v152_v45, %v144_v44  ;;  %v1386_v52 = vpack.c.bf16 %v167_v47, %v159_v46  ;;  %v158_v53 = vld [vmem:[#allocation2 + $0x200] sm:$0xff]  ;;  %v160_v55 = vld [vmem:[#allocation2 + $0x210] sm:$0xff] }
  0x58   :  { %1381 = vmatpush1.bf16.msra.mxu0 %v1380_v34  ;;  %v166_v54 = vld [vmem:[#allocation2 + $0x240] sm:$0xff]  ;;  %v1450_v56 = vpack.c.bf16 %v169_v49, %v161_v48  ;;  %v168_v57 = vld [vmem:[#allocation2 + $0x250] sm:$0xff]  ;;  %v175_v58 = vld [vmem:[#allocation2 + $0x288] sm:$0xff] }
  0x59   :  { %1445 = vmatpush1.bf16.msra.mxu1 %v1444_v38  ;;  %1383 = vmatprep.subr.bf16.mxu0 %v1382_v39  ;;  %v183_v59 = vld [vmem:[#allocation2 + $0x2c8] sm:$0xff]  ;;  %v177_v60 = vld [vmem:[#allocation2 + $0x298] sm:$0xff]  ;;  %v1388_v62 = vpack.c.bf16 %v166_v54, %v158_v53  ;;  %v1452_v63 = vpack.c.bf16 %v168_v57, %v160_v55  ;;  %v174_v1 = vld [vmem:[#allocation2 + $0x280] sm:$0xff] }
  0x5a   :  { %1447 = vmatprep.subr.bf16.mxu1 %v1446_v43  ;;  %v185_v61 = vld [vmem:[#allocation2 + $0x2d8] sm:$0xff]  ;;  %v1390_v0 = vpack.c.bf16 %v183_v59, %v175_v58  ;;  %v182_v2 = vld [vmem:[#allocation2 + $0x2c0] sm:$0xff]  ;;  %v176_v3 = vld [vmem:[#allocation2 + $0x290] sm:$0xff] }
  0x5b   :  { %v1454_v4 = vpack.c.bf16 %v185_v61, %v177_v60  ;;  %v184_v5 = vld [vmem:[#allocation2 + $0x2d0] sm:$0xff]  ;;  %v191_v6 = vld [vmem:[#allocation2 + $0x308] sm:$0xff]  ;;  %v193_v8 = vld [vmem:[#allocation2 + $0x318] sm:$0xff]  ;;  %v1392_v10 = vpack.c.bf16 %v182_v2, %v174_v1 }
  0x5c   :  { %1385 = vmatpush1.bf16.msra.mxu0 %v1384_v50  ;;  %v199_v7 = vld [vmem:[#allocation2 + $0x348] sm:$0xff]  ;;  %v201_v9 = vld [vmem:[#allocation2 + $0x358] sm:$0xff]  ;;  %v1456_v11 = vpack.c.bf16 %v184_v5, %v176_v3  ;;  %v190_v13 = vld [vmem:[#allocation2 + $0x300] sm:$0xff] }
  0x5d   :  { %1449 = vmatpush1.bf16.msra.mxu1 %v1448_v51  ;;  %1387 = vmatprep.subr.bf16.mxu0 %v1386_v52  ;;  %v1394_v12 = vpack.c.bf16 %v199_v7, %v191_v6  ;;  %v198_v14 = vld [vmem:[#allocation2 + $0x340] sm:$0xff]  ;;  %v192_v15 = vld [vmem:[#allocation2 + $0x310] sm:$0xff]  ;;  %v1458_v16 = vpack.c.bf16 %v201_v9, %v193_v8  ;;  %v207_v18 = vld [vmem:[#allocation2 + $0x388] sm:$0xff] }
  0x5e   :  { %1451 = vmatprep.subr.bf16.mxu1 %v1450_v56  ;;  %v200_v17 = vld [vmem:[#allocation2 + $0x350] sm:$0xff]  ;;  %v215_v19 = vld [vmem:[#allocation2 + $0x3c8] sm:$0xff]  ;;  %v209_v20 = vld [vmem:[#allocation2 + $0x398] sm:$0xff]  ;;  %v1396_v22 = vpack.c.bf16 %v198_v14, %v190_v13 }
  0x5f   :  { %v217_v21 = vld [vmem:[#allocation2 + $0x3d8] sm:$0xff]  ;;  %v1460_v23 = vpack.c.bf16 %v200_v17, %v192_v15  ;;  %v1398_v24 = vpack.c.bf16 %v215_v19, %v207_v18  ;;  %v206_v25 = vld [vmem:[#allocation2 + $0x380] sm:$0xff]  ;;  %v208_v27 = vld [vmem:[#allocation2 + $0x390] sm:$0xff] }
  0x60   :  { %1389 = vmatpush1.bf16.msra.mxu0 %v1388_v62  ;;  %v214_v26 = vld [vmem:[#allocation2 + $0x3c0] sm:$0xff]  ;;  %v1462_v28 = vpack.c.bf16 %v217_v21, %v209_v20  ;;  %v216_v29 = vld [vmem:[#allocation2 + $0x3d0] sm:$0xff]  ;;  %v223_v30 = vld [vmem:[#allocation2 + $0x408] sm:$0xff] }
  0x61   :  { %1453 = vmatpush1.bf16.msra.mxu1 %v1452_v63  ;;  %1391 = vmatprep.subr.bf16.mxu0 %v1390_v0  ;;  %v231_v31 = vld [vmem:[#allocation2 + $0x448] sm:$0xff]  ;;  %v225_v32 = vld [vmem:[#allocation2 + $0x418] sm:$0xff]  ;;  %v1400_v34 = vpack.c.bf16 %v214_v26, %v206_v25  ;;  %v1464_v35 = vpack.c.bf16 %v216_v29, %v208_v27  ;;  %v222_v37 = vld [vmem:[#allocation2 + $0x400] sm:$0xff] }
  0x62   :  { %1455 = vmatprep.subr.bf16.mxu1 %v1454_v4  ;;  %v233_v33 = vld [vmem:[#allocation2 + $0x458] sm:$0xff]  ;;  %v1402_v36 = vpack.c.bf16 %v231_v31, %v223_v30  ;;  %v230_v38 = vld [vmem:[#allocation2 + $0x440] sm:$0xff]  ;;  %v224_v39 = vld [vmem:[#allocation2 + $0x410] sm:$0xff] }
  0x63   :  { %v1466_v40 = vpack.c.bf16 %v233_v33, %v225_v32  ;;  %v232_v41 = vld [vmem:[#allocation2 + $0x450] sm:$0xff]  ;;  %v239_v42 = vld [vmem:[#allocation2 + $0x488] sm:$0xff]  ;;  %v241_v44 = vld [vmem:[#allocation2 + $0x498] sm:$0xff]  ;;  %v1404_v46 = vpack.c.bf16 %v230_v38, %v222_v37 }
  0x64   :  { %1393 = vmatpush1.bf16.msra.mxu0 %v1392_v10  ;;  %v247_v43 = vld [vmem:[#allocation2 + $0x4c8] sm:$0xff]  ;;  %v249_v45 = vld [vmem:[#allocation2 + $0x4d8] sm:$0xff]  ;;  %v1468_v47 = vpack.c.bf16 %v232_v41, %v224_v39  ;;  %v238_v49 = vld [vmem:[#allocation2 + $0x480] sm:$0xff] }
  0x65   :  { %1457 = vmatpush1.bf16.msra.mxu1 %v1456_v11  ;;  %1395 = vmatprep.subr.bf16.mxu0 %v1394_v12  ;;  %v1406_v48 = vpack.c.bf16 %v247_v43, %v239_v42  ;;  %v246_v50 = vld [vmem:[#allocation2 + $0x4c0] sm:$0xff]  ;;  %v240_v51 = vld [vmem:[#allocation2 + $0x490] sm:$0xff]  ;;  %v1470_v52 = vpack.c.bf16 %v249_v45, %v241_v44  ;;  %v255_v54 = vld [vmem:[#allocation2 + $0x508] sm:$0xff] }
  0x66   :  { %1459 = vmatprep.subr.bf16.mxu1 %v1458_v16  ;;  %v248_v53 = vld [vmem:[#allocation2 + $0x4d0] sm:$0xff]  ;;  %v263_v55 = vld [vmem:[#allocation2 + $0x548] sm:$0xff]  ;;  %v257_v56 = vld [vmem:[#allocation2 + $0x518] sm:$0xff]  ;;  %v1408_v58 = vpack.c.bf16 %v246_v50, %v238_v49 }
  0x67   :  { %v265_v57 = vld [vmem:[#allocation2 + $0x558] sm:$0xff]  ;;  %v1472_v59 = vpack.c.bf16 %v248_v53, %v240_v51  ;;  %v1410_v60 = vpack.c.bf16 %v263_v55, %v255_v54  ;;  %v254_v61 = vld [vmem:[#allocation2 + $0x500] sm:$0xff]  ;;  %v256_v63 = vld [vmem:[#allocation2 + $0x510] sm:$0xff] }
  0x68   :  { %1397 = vmatpush1.bf16.msra.mxu0 %v1396_v22  ;;  %v262_v62 = vld [vmem:[#allocation2 + $0x540] sm:$0xff]  ;;  %v1474_v0 = vpack.c.bf16 %v265_v57, %v257_v56  ;;  %v264_v1 = vld [vmem:[#allocation2 + $0x550] sm:$0xff]  ;;  %v271_v2 = vld [vmem:[#allocation2 + $0x588] sm:$0xff] }
  0x69   :  { %1461 = vmatpush1.bf16.msra.mxu1 %v1460_v23  ;;  %1399 = vmatprep.subr.bf16.mxu0 %v1398_v24  ;;  %v279_v3 = vld [vmem:[#allocation2 + $0x5c8] sm:$0xff]  ;;  %v273_v4 = vld [vmem:[#allocation2 + $0x598] sm:$0xff]  ;;  %v1412_v6 = vpack.c.bf16 %v262_v62, %v254_v61  ;;  %v270_v7 = vld [vmem:[#allocation2 + $0x580] sm:$0xff]  ;;  %v1476_v8 = vpack.c.bf16 %v264_v1, %v256_v63 }
  0x6a   :  { %1463 = vmatprep.subr.bf16.mxu1 %v1462_v28  ;;  %v281_v5 = vld [vmem:[#allocation2 + $0x5d8] sm:$0xff]  ;;  %v1414_v9 = vpack.c.bf16 %v279_v3, %v271_v2  ;;  %v278_v10 = vld [vmem:[#allocation2 + $0x5c0] sm:$0xff]  ;;  %v272_v11 = vld [vmem:[#allocation2 + $0x590] sm:$0xff] }
  0x6b   :  { %v280_v12 = vld [vmem:[#allocation2 + $0x5d0] sm:$0xff]  ;;  %v1478_v13 = vpack.c.bf16 %v281_v5, %v273_v4  ;;  %v287_v14 = vld [vmem:[#allocation2 + $0x608] sm:$0xff]  ;;  %v289_v17 = vld [vmem:[#allocation2 + $0x618] sm:$0xff]  ;;  %v1416_v19 = vpack.c.bf16 %v278_v10, %v270_v7 }
  0x6c   :  { %1401 = vmatpush1.bf16.msra.mxu0 %v1400_v34  ;;  %v295_v15 = vld [vmem:[#allocation2 + $0x648] sm:$0xff]  ;;  %v297_v18 = vld [vmem:[#allocation2 + $0x658] sm:$0xff]  ;;  %v1480_v20 = vpack.c.bf16 %v280_v12, %v272_v11  ;;  %v286_v22 = vld [vmem:[#allocation2 + $0x600] sm:$0xff] }
  0x6d   :  { %1465 = vmatpush1.bf16.msra.mxu1 %v1464_v35  ;;  %1403 = vmatprep.subr.bf16.mxu0 %v1402_v36  ;;  %v2007_v16 = vld [vmem:[%s2192_s0 + $0x8] sm:$0xff]  ;;  %v1418_v21 = vpack.c.bf16 %v295_v15, %v287_v14  ;;  %v294_v23 = vld [vmem:[#allocation2 + $0x640] sm:$0xff]  ;;  %v288_v24 = vld [vmem:[#allocation2 + $0x610] sm:$0xff]  ;;  %v1482_v25 = vpack.c.bf16 %v297_v18, %v289_v17 }
  0x6e   :  { %1467 = vmatprep.subr.bf16.mxu1 %v1466_v40  ;;  %456 = vmatprep.mubr.f32.mxu0 %v2007_v16  ;;  %v296_v26 = vld [vmem:[#allocation2 + $0x650] sm:$0xff]  ;;  %v303_v27 = vld [vmem:[#allocation2 + $0x688] sm:$0xff]  ;;  %v305_v29 = vld [vmem:[#allocation2 + $0x698] sm:$0xff]  ;;  %v1420_v31 = vpack.c.bf16 %v294_v23, %v286_v22 }
  0x6f   :  { %533 = vmatprep.mubr.f32.mxu1 %v2007_v16  ;;  %v311_v28 = vld [vmem:[#allocation2 + $0x6c8] sm:$0xff]  ;;  %v313_v30 = vld [vmem:[#allocation2 + $0x6d8] sm:$0xff]  ;;  %v1484_v32 = vpack.c.bf16 %v296_v26, %v288_v24  ;;  %v302_v34 = vld [vmem:[#allocation2 + $0x680] sm:$0xff] }
  0x70   :  { %1405 = vmatpush1.bf16.msra.mxu0 %v1404_v46  ;;  %v1422_v33 = vpack.c.bf16 %v311_v28, %v303_v27  ;;  %v310_v35 = vld [vmem:[#allocation2 + $0x6c0] sm:$0xff]  ;;  %v304_v36 = vld [vmem:[#allocation2 + $0x690] sm:$0xff]  ;;  %v1486_v37 = vpack.c.bf16 %v313_v30, %v305_v29  ;;  %v319_v39 = vld [vmem:[#allocation2 + $0x708] sm:$0xff] }
  0x71   :  { %1469 = vmatpush1.bf16.msra.mxu1 %v1468_v47  ;;  %1407 = vmatprep.subr.bf16.mxu0 %v1406_v48  ;;  %v312_v38 = vld [vmem:[#allocation2 + $0x6d0] sm:$0xff]  ;;  %v327_v40 = vld [vmem:[#allocation2 + $0x748] sm:$0xff]  ;;  %v321_v41 = vld [vmem:[#allocation2 + $0x718] sm:$0xff]  ;;  %v1424_v43 = vpack.c.bf16 %v310_v35, %v302_v34 }
  0x72   :  { %1471 = vmatprep.subr.bf16.mxu1 %v1470_v52  ;;  %v329_v42 = vld [vmem:[#allocation2 + $0x758] sm:$0xff]  ;;  %v1488_v44 = vpack.c.bf16 %v312_v38, %v304_v36  ;;  %v1426_v45 = vpack.c.bf16 %v327_v40, %v319_v39  ;;  %v318_v46 = vld [vmem:[#allocation2 + $0x700] sm:$0xff]  ;;  %v320_v48 = vld [vmem:[#allocation2 + $0x710] sm:$0xff] }
  0x73   :  { %v326_v47 = vld [vmem:[#allocation2 + $0x740] sm:$0xff]  ;;  %v1490_v49 = vpack.c.bf16 %v329_v42, %v321_v41  ;;  %v328_v50 = vld [vmem:[#allocation2 + $0x750] sm:$0xff]  ;;  %v335_v51 = vld [vmem:[#allocation2 + $0x788] sm:$0xff] }
  0x74   :  { %1409 = vmatpush1.bf16.msra.mxu0 %v1408_v58  ;;  %v343_v52 = vld [vmem:[#allocation2 + $0x7c8] sm:$0xff]  ;;  %v337_v53 = vld [vmem:[#allocation2 + $0x798] sm:$0xff]  ;;  %v1428_v55 = vpack.c.bf16 %v326_v47, %v318_v46  ;;  %v1492_v56 = vpack.c.bf16 %v328_v50, %v320_v48  ;;  %v334_v58 = vld [vmem:[#allocation2 + $0x780] sm:$0xff] }
  0x75   :  { %1473 = vmatpush1.bf16.msra.mxu1 %v1472_v59  ;;  %1411 = vmatprep.subr.bf16.mxu0 %v1410_v60  ;;  %v345_v54 = vld [vmem:[#allocation2 + $0x7d8] sm:$0xff]  ;;  %v1430_v57 = vpack.c.bf16 %v343_v52, %v335_v51  ;;  %v342_v59 = vld [vmem:[#allocation2 + $0x7c0] sm:$0xff]  ;;  %v336_v60 = vld [vmem:[#allocation2 + $0x790] sm:$0xff] }
  0x76   :  { %1475 = vmatprep.subr.bf16.mxu1 %v1474_v0  ;;  %v1494_v61 = vpack.c.bf16 %v345_v54, %v337_v53  ;;  %v344_v62 = vld [vmem:[#allocation2 + $0x7d0] sm:$0xff]  ;;  %v99_v63 = vld [vmem:[#allocation2 + $0x28] sm:$0xff]  ;;  %v101_v1 = vld [vmem:[#allocation2 + $0x38] sm:$0xff]  ;;  %v1432_v3 = vpack.c.bf16 %v342_v59, %v334_v58 }
  0x77   :  { %v107_v0 = vld [vmem:[#allocation2 + $0x68] sm:$0xff]  ;;  %v109_v2 = vld [vmem:[#allocation2 + $0x78] sm:$0xff]  ;;  %v1496_v4 = vpack.c.bf16 %v344_v62, %v336_v60  ;;  %v106_v7 = vld [vmem:[#allocation2 + $0x60] sm:$0xff] }
  0x78   :  { %1413 = vmatpush1.bf16.msra.mxu0 %v1412_v6  ;;  %v1498_v5 = vpack.c.bf16 %v107_v0, %v99_v63  ;;  %v98_v6 = vld [vmem:[#allocation2 + $0x20] sm:$0xff]  ;;  %v108_v10 = vld [vmem:[#allocation2 + $0x70] sm:$0xff]  ;;  %v115_v11 = vld [vmem:[#allocation2 + $0xa8] sm:$0xff] }
  0x79   :  { %1477 = vmatpush1.bf16.msra.mxu1 %v1476_v8  ;;  %1415 = vmatprep.subr.bf16.mxu0 %v1414_v9  ;;  %v100_v8 = vld [vmem:[#allocation2 + $0x30] sm:$0xff]  ;;  %v1562_v9 = vpack.c.bf16 %v109_v2, %v101_v1  ;;  %v123_v12 = vld [vmem:[#allocation2 + $0xe8] sm:$0xff]  ;;  %v125_v14 = vld [vmem:[#allocation2 + $0xf8] sm:$0xff]  ;;  %v1500_v17 = vpack.c.bf16 %v106_v7, %v98_v6 }
  0x7a   :  { %1479 = vmatprep.subr.bf16.mxu1 %v1478_v13  ;;  %v117_v13 = vld [vmem:[#allocation2 + $0xb8] sm:$0xff]  ;;  %v2014_v15 = vld [vmem:[%s2192_s0] sm:$0xff]  ;;  %v1564_v18 = vpack.c.bf16 %v108_v10, %v100_v8  ;;  %v116_v22 = vld [vmem:[#allocation2 + $0xb0] sm:$0xff] }
  0x7b   :  { %v1566_v23 = vpack.c.bf16 %v125_v14, %v117_v13  ;;  %v124_v24 = vld [vmem:[#allocation2 + $0xf0] sm:$0xff]  ;;  %v139_v26 = vld [vmem:[#allocation2 + $0x168] sm:$0xff]  ;;  %v133_v27 = vld [vmem:[#allocation2 + $0x138] sm:$0xff] }
  0x7c   :  { %1417 = vmatpush1.bf16.msra.mxu0 %v1416_v19  ;;  %v1502_v19 = vpack.c.bf16 %v123_v12, %v115_v11  ;;  %v141_v28 = vld [vmem:[#allocation2 + $0x178] sm:$0xff]  ;;  %v1568_v30 = vpack.c.bf16 %v124_v24, %v116_v22  ;;  %v132_v34 = vld [vmem:[#allocation2 + $0x130] sm:$0xff]  ;;  %v155_v38 = vld [vmem:[#allocation2 + $0x1e8] sm:$0xff] }
  0x7d   :  { %1481 = vmatpush1.bf16.msra.mxu1 %v1480_v20  ;;  %1419 = vmatprep.subr.bf16.mxu0 %v1418_v21  ;;  %v114_v20 = vld [vmem:[#allocation2 + $0xa0] sm:$0xff]  ;;  %v1570_v35 = vpack.c.bf16 %v141_v28, %v133_v27  ;;  %v140_v36 = vld [vmem:[#allocation2 + $0x170] sm:$0xff]  ;;  %v149_v39 = vld [vmem:[#allocation2 + $0x1b8] sm:$0xff] }
  0x7e   :  { %1483 = vmatprep.subr.bf16.mxu1 %v1482_v25  ;;  %v122_v21 = vld [vmem:[#allocation2 + $0xe0] sm:$0xff]  ;;  %v131_v25 = vld [vmem:[#allocation2 + $0x128] sm:$0xff]  ;;  %v157_v40 = vld [vmem:[#allocation2 + $0x1f8] sm:$0xff]  ;;  %v1572_v42 = vpack.c.bf16 %v140_v36, %v132_v34 }
  0x7f   :  { %v1504_v29 = vpack.c.bf16 %v122_v21, %v114_v20  ;;  %v148_v46 = vld [vmem:[#allocation2 + $0x1b0] sm:$0xff]  ;;  %v1574_v47 = vpack.c.bf16 %v157_v40, %v149_v39  ;;  %v171_v50 = vld [vmem:[#allocation2 + $0x268] sm:$0xff]  ;;  %v165_v51 = vld [vmem:[#allocation2 + $0x238] sm:$0xff] }
  0x80   :  { %1421 = vmatpush1.bf16.msra.mxu0 %v1420_v31  ;;  %v1506_v31 = vpack.c.bf16 %v139_v26, %v131_v25  ;;  %v156_v48 = vld [vmem:[#allocation2 + $0x1f0] sm:$0xff]  ;;  %v173_v52 = vld [vmem:[#allocation2 + $0x278] sm:$0xff]  ;;  %v187_v62 = vld [vmem:[#allocation2 + $0x2e8] sm:$0xff] }
  0x81   :  { %1485 = vmatpush1.bf16.msra.mxu1 %v1484_v32  ;;  %1423 = vmatprep.subr.bf16.mxu0 %v1422_v33  ;;  %v130_v32 = vld [vmem:[#allocation2 + $0x120] sm:$0xff]  ;;  %v1576_v54 = vpack.c.bf16 %v156_v48, %v148_v46  ;;  %v164_v58 = vld [vmem:[#allocation2 + $0x230] sm:$0xff]  ;;  %v1578_v59 = vpack.c.bf16 %v173_v52, %v165_v51  ;;  %v181_v63 = vld [vmem:[#allocation2 + $0x2b8] sm:$0xff] }
  0x82   :  { %1487 = vmatprep.subr.bf16.mxu1 %v1486_v37  ;;  %v138_v33 = vld [vmem:[#allocation2 + $0x160] sm:$0xff]  ;;  %v147_v37 = vld [vmem:[#allocation2 + $0x1a8] sm:$0xff]  ;;  %v172_v60 = vld [vmem:[#allocation2 + $0x270] sm:$0xff] }
  0x83   :  { %v1508_v41 = vpack.c.bf16 %v138_v33, %v130_v32  ;;  %v189_v0 = vld [vmem:[#allocation2 + $0x2f8] sm:$0xff]  ;;  %v1580_v2 = vpack.c.bf16 %v172_v60, %v164_v58  ;;  %v180_v6 = vld [vmem:[#allocation2 + $0x2b0] sm:$0xff]  ;;  %v203_v10 = vld [vmem:[#allocation2 + $0x368] sm:$0xff] }
  0x84   :  { %1425 = vmatpush1.bf16.msra.mxu0 %v1424_v43  ;;  %v1510_v43 = vpack.c.bf16 %v155_v38, %v147_v37  ;;  %v1582_v7 = vpack.c.bf16 %v189_v0, %v181_v63  ;;  %v188_v8 = vld [vmem:[#allocation2 + $0x2f0] sm:$0xff]  ;;  %v197_v11 = vld [vmem:[#allocation2 + $0x338] sm:$0xff]  ;;  %v194_v20 = vld [vmem:[#allocation2 + $0x320] sm:$0xff] }
  0x85   :  { %1489 = vmatpush1.bf16.msra.mxu1 %v1488_v44  ;;  %1427 = vmatprep.subr.bf16.mxu0 %v1426_v45  ;;  %v146_v44 = vld [vmem:[#allocation2 + $0x1a0] sm:$0xff]  ;;  %v205_v12 = vld [vmem:[#allocation2 + $0x378] sm:$0xff]  ;;  %v196_v22 = vld [vmem:[#allocation2 + $0x330] sm:$0xff] }
  0x86   :  { %1491 = vmatprep.subr.bf16.mxu1 %v1490_v49  ;;  %v154_v45 = vld [vmem:[#allocation2 + $0x1e0] sm:$0xff]  ;;  %v163_v49 = vld [vmem:[#allocation2 + $0x228] sm:$0xff]  ;;  %v2021_v13 = vld [vmem:[%s2192_s0 + $0x18] sm:$0xff] }
  0x87   :  { %v1512_v53 = vpack.c.bf16 %v154_v45, %v146_v44  ;;  %v202_v21 = vld [vmem:[#allocation2 + $0x360] sm:$0xff]  ;;  %v204_v24 = vld [vmem:[#allocation2 + $0x370] sm:$0xff]  ;;  %v211_v25 = vld [vmem:[#allocation2 + $0x3a8] sm:$0xff] }
  0x88   :  { %1429 = vmatpush1.bf16.msra.mxu0 %v1428_v55  ;;  %v1514_v55 = vpack.c.bf16 %v171_v50, %v163_v49  ;;  %v219_v26 = vld [vmem:[#allocation2 + $0x3e8] sm:$0xff]  ;;  %v213_v27 = vld [vmem:[#allocation2 + $0x3b8] sm:$0xff]  ;;  %v210_v32 = vld [vmem:[#allocation2 + $0x3a0] sm:$0xff] }
  0x89   :  { %1493 = vmatpush1.bf16.msra.mxu1 %v1492_v56  ;;  %1431 = vmatprep.subr.bf16.mxu0 %v1430_v57  ;;  %v162_v56 = vld [vmem:[#allocation2 + $0x220] sm:$0xff]  ;;  %v221_v28 = vld [vmem:[#allocation2 + $0x3f8] sm:$0xff]  ;;  %v212_v34 = vld [vmem:[#allocation2 + $0x3b0] sm:$0xff] }
  0x8a   :  { %1495 = vmatprep.subr.bf16.mxu1 %v1494_v61  ;;  %v170_v57 = vld [vmem:[#allocation2 + $0x260] sm:$0xff]  ;;  %v179_v61 = vld [vmem:[#allocation2 + $0x2a8] sm:$0xff]  ;;  %v220_v36 = vld [vmem:[#allocation2 + $0x3f0] sm:$0xff] }
  0x8b   :  { %v1516_v1 = vpack.c.bf16 %v170_v57, %v162_v56  ;;  %v218_v33 = vld [vmem:[#allocation2 + $0x3e0] sm:$0xff]  ;;  %v227_v37 = vld [vmem:[#allocation2 + $0x428] sm:$0xff]  ;;  %v229_v39 = vld [vmem:[#allocation2 + $0x438] sm:$0xff] }
  0x8c   :  { %1433 = vmatpush1.bf16.msra.mxu0 %v1432_v3  ;;  %v1518_v3 = vpack.c.bf16 %v187_v62, %v179_v61  ;;  %v235_v38 = vld [vmem:[#allocation2 + $0x468] sm:$0xff]  ;;  %v237_v40 = vld [vmem:[#allocation2 + $0x478] sm:$0xff]  ;;  %v226_v44 = vld [vmem:[#allocation2 + $0x420] sm:$0xff] }
  0x8d   :  { %1497 = vmatpush1.bf16.msra.mxu1 %v1496_v4  ;;  %1499 = vmatprep.subr.bf16.mxu0 %v1498_v5  ;;  %v178_v4 = vld [vmem:[#allocation2 + $0x2a0] sm:$0xff]  ;;  %v228_v46 = vld [vmem:[#allocation2 + $0x430] sm:$0xff]  ;;  %v243_v49 = vld [vmem:[#allocation2 + $0x4a8] sm:$0xff] }
  0x8e   :  { %1563 = vmatprep.subr.bf16.mxu1 %v1562_v9  ;;  %v186_v5 = vld [vmem:[#allocation2 + $0x2e0] sm:$0xff]  ;;  %v195_v9 = vld [vmem:[#allocation2 + $0x328] sm:$0xff]  ;;  %v236_v48 = vld [vmem:[#allocation2 + $0x470] sm:$0xff] }
  0x8f   :  { %457 = vmatmul.mubr.f32.vlgmr.msra.gmra.mrb[0].mxu0 %v2014_v15  ;;  %v1520_v14 = vpack.c.bf16 %v186_v5, %v178_v4  ;;  %v234_v45 = vld [vmem:[#allocation2 + $0x460] sm:$0xff]  ;;  %v251_v50 = vld [vmem:[#allocation2 + $0x4e8] sm:$0xff]  ;;  %v245_v51 = vld [vmem:[#allocation2 + $0x4b8] sm:$0xff] }
  0x90   :  { %534 = vmatmul.mubr.f32.vlgmr.msra.gmra.mrb[0].mxu1 %v2014_v15  ;;  %1501 = vmatpush1.bf16.msra.mxu0 %v1500_v17  ;;  %v2027_v17 = vld [vmem:[%s2192_s0 + $0x10] sm:$0xff]  ;;  %v253_v52 = vld [vmem:[#allocation2 + $0x4f8] sm:$0xff]  ;;  %v250_v56 = vld [vmem:[#allocation2 + $0x4e0] sm:$0xff] }
  0x91   :  { %1565 = vmatpush1.bf16.msra.mxu1 %v1564_v18  ;;  %1503 = vmatprep.subr.bf16.mxu0 %v1502_v19  ;;  %v1584_v18 = vpack.c.bf16 %v188_v8, %v180_v6  ;;  %v1522_v19 = vpack.c.bf16 %v203_v10, %v195_v9  ;;  %v244_v57 = vld [vmem:[#allocation2 + $0x4b0] sm:$0xff]  ;;  %v1598_v58 = vpack.c.bf16 %v253_v52, %v245_v51  ;;  %v259_v60 = vld [vmem:[#allocation2 + $0x528] sm:$0xff]  ;;  %v261_v62 = vld [vmem:[#allocation2 + $0x538] sm:$0xff] }
  0x92   :  { %1567 = vmatprep.subr.bf16.mxu1 %v1566_v23  ;;  %462 = vmatprep.mubr.f32.mxu0 %v2021_v13  ;;  %v1586_v23 = vpack.c.bf16 %v205_v12, %v197_v11  ;;  %v267_v61 = vld [vmem:[#allocation2 + $0x568] sm:$0xff]  ;;  %v269_v63 = vld [vmem:[#allocation2 + $0x578] sm:$0xff]  ;;  %v266_v4 = vld [vmem:[#allocation2 + $0x560] sm:$0xff] }
  0x93   :  { %539 = vmatprep.mubr.f32.mxu1 %v2021_v13  ;;  %463 = vmatmul.mubr.f32.gmra.mrb[2].mxu0 %v2027_v17  ;;  %v260_v5 = vld [vmem:[#allocation2 + $0x530] sm:$0xff]  ;;  %v1602_v6 = vpack.c.bf16 %v269_v63, %v261_v62  ;;  %v275_v8 = vld [vmem:[#allocation2 + $0x5a8] sm:$0xff]  ;;  %v277_v10 = vld [vmem:[#allocation2 + $0x5b8] sm:$0xff] }
  0x94   :  { %1505 = vmatpush1.bf16.msra.mxu0 %v1504_v29  ;;  %540 = vmatmul.mubr.f32.gmra.mrb[2].mxu1 %v2027_v17  ;;  %v1524_v29 = vpack.c.bf16 %v202_v21, %v194_v20  ;;  %v283_v9 = vld [vmem:[#allocation2 + $0x5e8] sm:$0xff]  ;;  %v285_v11 = vld [vmem:[#allocation2 + $0x5f8] sm:$0xff]  ;;  %v282_v20 = vld [vmem:[#allocation2 + $0x5e0] sm:$0xff] }
  0x95   :  { %1569 = vmatpush1.bf16.msra.mxu1 %v1568_v30  ;;  %1507 = vmatprep.subr.bf16.mxu0 %v1506_v31  ;;  %v1588_v30 = vpack.c.bf16 %v204_v24, %v196_v22  ;;  %v1526_v31 = vpack.c.bf16 %v219_v26, %v211_v25  ;;  %v276_v21 = vld [vmem:[#allocation2 + $0x5b0] sm:$0xff]  ;;  %v1606_v22 = vpack.c.bf16 %v285_v11, %v277_v10  ;;  %v291_v24 = vld [vmem:[#allocation2 + $0x628] sm:$0xff]  ;;  %v293_v26 = vld [vmem:[#allocation2 + $0x638] sm:$0xff] }
  0x96   :  { %1571 = vmatprep.subr.bf16.mxu1 %v1570_v35  ;;  %610 = vmatprep.mubr.f32.mxu0 %v2007_v16  ;;  %v1590_v35 = vpack.c.bf16 %v221_v28, %v213_v27  ;;  %v299_v25 = vld [vmem:[#allocation2 + $0x668] sm:$0xff]  ;;  %v301_v27 = vld [vmem:[#allocation2 + $0x678] sm:$0xff]  ;;  %v745_v10 = vld [vmem:[#allocation7 + $0x88] sm:$0xff] }
  0x97   :  { %687 = vmatprep.mubr.f32.mxu1 %v2007_v16  ;;  %v1532_v16 = vpack.c.bf16 %v234_v45, %v226_v44  ;;  %v314_v44 = vld [vmem:[#allocation2 + $0x6e0] sm:$0xff]  ;;  %v308_v45 = vld [vmem:[#allocation2 + $0x6b0] sm:$0xff]  ;;  %v333_v51 = vld [vmem:[#allocation2 + $0x778] sm:$0xff] }
  0x98   :  { %1509 = vmatpush1.bf16.msra.mxu0 %v1508_v41  ;;  %v1528_v41 = vpack.c.bf16 %v218_v33, %v210_v32  ;;  %v298_v32 = vld [vmem:[#allocation2 + $0x660] sm:$0xff]  ;;  %v292_v33 = vld [vmem:[#allocation2 + $0x630] sm:$0xff]  ;;  %v349_v62 = vld [vmem:[#allocation2 + $0x7f8] sm:$0xff] }
  0x99   :  { %1573 = vmatpush1.bf16.msra.mxu1 %v1572_v42  ;;  %1511 = vmatprep.subr.bf16.mxu0 %v1510_v43  ;;  %v1592_v42 = vpack.c.bf16 %v220_v36, %v212_v34  ;;  %v1530_v43 = vpack.c.bf16 %v235_v38, %v227_v37  ;;  %v1610_v34 = vpack.c.bf16 %v301_v27, %v293_v26  ;;  %v307_v36 = vld [vmem:[#allocation2 + $0x6a8] sm:$0xff]  ;;  %v309_v38 = vld [vmem:[#allocation2 + $0x6b8] sm:$0xff] }
  0x9a   :  { %1575 = vmatprep.subr.bf16.mxu1 %v1574_v47  ;;  %v1594_v47 = vpack.c.bf16 %v237_v40, %v229_v39  ;;  %v315_v37 = vld [vmem:[#allocation2 + $0x6e8] sm:$0xff]  ;;  %v317_v39 = vld [vmem:[#allocation2 + $0x6f8] sm:$0xff] }
  0x9b   :  { %v728_v11 = vld [vmem:[#allocation7] sm:$0xff]  ;;  %v750_v27 = vld [vmem:[#allocation7 + $0xb0] sm:$0xff] }
  0x9c   :  { %1513 = vmatpush1.bf16.msra.mxu0 %v1512_v53  ;;  %v1596_v53 = vpack.c.bf16 %v236_v48, %v228_v46  ;;  %v1614_v46 = vpack.c.bf16 %v317_v39, %v309_v38  ;;  %v323_v48 = vld [vmem:[#allocation2 + $0x728] sm:$0xff]  ;;  %v737_v38 = vld [vmem:[#allocation7 + $0x48] sm:$0xff]  ;;  %v754_v39 = vld [vmem:[#allocation7 + $0xd0] sm:$0xff] }
  0x9d   :  { %1577 = vmatpush1.bf16.msra.mxu1 %v1576_v54  ;;  %1515 = vmatprep.subr.bf16.mxu0 %v1514_v55  ;;  %v1534_v54 = vpack.c.bf16 %v251_v50, %v243_v49  ;;  %v242_v55 = vld [vmem:[#allocation2 + $0x4a0] sm:$0xff]  ;;  %v331_v49 = vld [vmem:[#allocation2 + $0x768] sm:$0xff]  ;;  %v325_v50 = vld [vmem:[#allocation2 + $0x738] sm:$0xff] }
  0x9e   :  { %1579 = vmatprep.subr.bf16.mxu1 %v1578_v59  ;;  %v252_v59 = vld [vmem:[#allocation2 + $0x4f0] sm:$0xff]  ;;  %v1536_v0 = vpack.c.bf16 %v250_v56, %v242_v55  ;;  %v330_v55 = vld [vmem:[#allocation2 + $0x760] sm:$0xff]  ;;  %v732_v26 = vld [vmem:[#allocation7 + $0x20] sm:$0xff] }
  0x9f   :  { %v324_v56 = vld [vmem:[#allocation2 + $0x730] sm:$0xff] }
  0xa0   :  { %1517 = vmatpush1.bf16.msra.mxu0 %v1516_v1  ;;  %v1600_v1 = vpack.c.bf16 %v252_v59, %v244_v57  ;;  %v1618_v57 = vpack.c.bf16 %v333_v51, %v325_v50  ;;  %v339_v59 = vld [vmem:[#allocation2 + $0x7a8] sm:$0xff]  ;;  %v741_v50 = vld [vmem:[#allocation7 + $0x68] sm:$0xff] }
  0xa1   :  { %1581 = vmatpush1.bf16.msra.mxu1 %v1580_v2  ;;  %1519 = vmatprep.subr.bf16.mxu0 %v1518_v3  ;;  %v1538_v2 = vpack.c.bf16 %v267_v61, %v259_v60  ;;  %v258_v3 = vld [vmem:[#allocation2 + $0x520] sm:$0xff]  ;;  %v347_v60 = vld [vmem:[#allocation2 + $0x7e8] sm:$0xff]  ;;  %v341_v61 = vld [vmem:[#allocation2 + $0x7b8] sm:$0xff] }
  0xa2   :  { %1583 = vmatprep.subr.bf16.mxu1 %v1582_v7  ;;  %v268_v7 = vld [vmem:[#allocation2 + $0x570] sm:$0xff]  ;;  %v1540_v12 = vpack.c.bf16 %v266_v4, %v258_v3  ;;  %v346_v3 = vld [vmem:[#allocation2 + $0x7e0] sm:$0xff]  ;;  %v1622_v4 = vpack.c.bf16 %v349_v62, %v341_v61  ;;  %v847_v61 = vld [vmem:[%s2197_s5 + $0x18] sm:$0xff] }
  0xa4   :  { %1521 = vmatpush1.bf16.msra.mxu0 %v1520_v14  ;;  %v1604_v14 = vpack.c.bf16 %v268_v7, %v260_v5  ;;  %v340_v5 = vld [vmem:[#allocation2 + $0x7b0] sm:$0xff] }
  0xa5   :  { %1585 = vmatpush1.bf16.msra.mxu1 %v1584_v18  ;;  %1523 = vmatprep.subr.bf16.mxu0 %v1522_v19  ;;  %v1542_v18 = vpack.c.bf16 %v283_v9, %v275_v8  ;;  %v274_v19 = vld [vmem:[#allocation2 + $0x5a0] sm:$0xff]  ;;  %v744_v9 = vld [vmem:[#allocation7 + $0x80] sm:$0xff] }
  0xa6   :  { %1587 = vmatprep.subr.bf16.mxu1 %v1586_v23  ;;  %v284_v23 = vld [vmem:[#allocation2 + $0x5f0] sm:$0xff]  ;;  %v1544_v28 = vpack.c.bf16 %v282_v20, %v274_v19  ;;  %v747_v19 = vld [vmem:[#allocation7 + $0x98] sm:$0xff] }
  0xa8   :  { %1525 = vmatpush1.bf16.msra.mxu0 %v1524_v29  ;;  %v1608_v29 = vpack.c.bf16 %v284_v23, %v276_v21  ;;  %v731_v23 = vld [vmem:[#allocation7 + $0x18] sm:$0xff] }
  0xa9   :  { %1589 = vmatpush1.bf16.msra.mxu1 %v1588_v30  ;;  %1527 = vmatprep.subr.bf16.mxu0 %v1526_v31  ;;  %v1546_v30 = vpack.c.bf16 %v299_v25, %v291_v24  ;;  %v290_v31 = vld [vmem:[#allocation2 + $0x620] sm:$0xff]  ;;  %v749_v24 = vld [vmem:[#allocation7 + $0xa8] sm:$0xff] }
  0xaa   :  { %1591 = vmatprep.subr.bf16.mxu1 %v1590_v35  ;;  %v300_v35 = vld [vmem:[#allocation2 + $0x670] sm:$0xff]  ;;  %v1548_v40 = vpack.c.bf16 %v298_v32, %v290_v31  ;;  %v734_v31 = vld [vmem:[#allocation7 + $0x30] sm:$0xff]  ;;  %v735_v32 = vld [vmem:[#allocation7 + $0x38] sm:$0xff] }
  0xac   :  { %1529 = vmatpush1.bf16.msra.mxu0 %v1528_v41  ;;  %v1612_v41 = vpack.c.bf16 %v300_v35, %v292_v33  ;;  %v1640_v33 = vpack.c.bf16 %v735_v32, %v734_v31  ;;  %v753_v35 = vld [vmem:[#allocation7 + $0xc8] sm:$0xff] }
  0xad   :  { %1593 = vmatpush1.bf16.msra.mxu1 %v1592_v42  ;;  %1531 = vmatprep.subr.bf16.mxu0 %v1530_v43  ;;  %v1550_v42 = vpack.c.bf16 %v315_v37, %v307_v36  ;;  %v306_v43 = vld [vmem:[#allocation2 + $0x6a0] sm:$0xff]  ;;  %v736_v37 = vld [vmem:[#allocation7 + $0x40] sm:$0xff] }
  0xae   :  { %1595 = vmatprep.subr.bf16.mxu1 %v1594_v47  ;;  %v316_v47 = vld [vmem:[#allocation2 + $0x6f0] sm:$0xff]  ;;  %v1552_v52 = vpack.c.bf16 %v314_v44, %v306_v43  ;;  %v738_v43 = vld [vmem:[#allocation7 + $0x50] sm:$0xff]  ;;  %v739_v44 = vld [vmem:[#allocation7 + $0x58] sm:$0xff] }
  0xb0   :  { %1533 = vmatpush1.bf16.msra.mxu0 %v1532_v16  ;;  %v1616_v16 = vpack.c.bf16 %v316_v47, %v308_v45  ;;  %v1648_v45 = vpack.c.bf16 %v739_v44, %v738_v43  ;;  %v757_v47 = vld [vmem:[#allocation7 + $0xe8] sm:$0xff] }
  0xb1   :  { %1597 = vmatpush1.bf16.msra.mxu1 %v1596_v53  ;;  %1535 = vmatprep.subr.bf16.mxu0 %v1534_v54  ;;  %v1554_v53 = vpack.c.bf16 %v331_v49, %v323_v48  ;;  %v322_v54 = vld [vmem:[#allocation2 + $0x720] sm:$0xff]  ;;  %v740_v49 = vld [vmem:[#allocation7 + $0x60] sm:$0xff] }
  0xb2   :  { %1599 = vmatprep.subr.bf16.mxu1 %v1598_v58  ;;  %v332_v58 = vld [vmem:[#allocation2 + $0x770] sm:$0xff]  ;;  %v1556_v63 = vpack.c.bf16 %v330_v55, %v322_v54  ;;  %v1652_v51 = vpack.c.bf16 %v741_v50, %v740_v49  ;;  %v742_v54 = vld [vmem:[#allocation7 + $0x70] sm:$0xff]  ;;  %v743_v55 = vld [vmem:[#allocation7 + $0x78] sm:$0xff] }
  0xb4   :  { %1537 = vmatpush1.bf16.msra.mxu0 %v1536_v0  ;;  %v1620_v0 = vpack.c.bf16 %v332_v58, %v324_v56  ;;  %v1656_v56 = vpack.c.bf16 %v743_v55, %v742_v54  ;;  %v845_v58 = vld [vmem:[%s2197_s5 + $0x8] sm:$0xff] }
  0xb5   :  { %1601 = vmatpush1.bf16.msra.mxu1 %v1600_v1  ;;  %1539 = vmatprep.subr.bf16.mxu0 %v1538_v2  ;;  %v1558_v1 = vpack.c.bf16 %v347_v60, %v339_v59  ;;  %v338_v2 = vld [vmem:[#allocation2 + $0x7a0] sm:$0xff]  ;;  %v846_v59 = vld [vmem:[%s2197_s5 + $0x10] sm:$0xff] }
  0xb6   :  { %1603 = vmatprep.subr.bf16.mxu1 %v1602_v6  ;;  %v348_v6 = vld [vmem:[#allocation2 + $0x7f0] sm:$0xff]  ;;  %v1560_v7 = vpack.c.bf16 %v346_v3, %v338_v2  ;;  %v1662_v62 = vpack.c.bf16 %v847_v61, %v846_v59  ;;  %v851_v3 = vld [vmem:[%s2197_s5 + $0x38] sm:$0xff] }
  0xb7   :  { %v1624_v8 = vpack.c.bf16 %v348_v6, %v340_v5  ;;  %v850_v2 = vld [vmem:[%s2197_s5 + $0x30] sm:$0xff]  ;;  %v852_v5 = vld [vmem:[%s2197_s5 + $0x40] sm:$0xff]  ;;  %v853_v6 = vld [vmem:[%s2197_s5 + $0x48] sm:$0xff] }
  0xb8   :  { %1541 = vmatpush1.bf16.msra.mxu0 %v1540_v12  ;;  %v1626_v12 = vpack.c.bf16 %v745_v10, %v744_v9 }
  0xb9   :  { %1605 = vmatpush1.bf16.msra.mxu1 %v1604_v14  ;;  %1543 = vmatprep.subr.bf16.mxu0 %v1542_v18  ;;  %v729_v14 = vld [vmem:[#allocation7 + $0x8] sm:$0xff]  ;;  %v746_v18 = vld [vmem:[#allocation7 + $0x90] sm:$0xff] }
  0xba   :  { %1607 = vmatprep.subr.bf16.mxu1 %v1606_v22  ;;  %v1628_v20 = vpack.c.bf16 %v729_v14, %v728_v11  ;;  %v1630_v21 = vpack.c.bf16 %v747_v19, %v746_v18  ;;  %v730_v22 = vld [vmem:[#allocation7 + $0x10] sm:$0xff]  ;;  %v350_v11 = vld [vmem:[#allocation5] sm:$0xff] }
  0xbc   :  { %1545 = vmatpush1.bf16.msra.mxu0 %v1544_v28  ;;  %v751_v28 = vld [vmem:[#allocation7 + $0xb8] sm:$0xff] }
  0xbd   :  { %1609 = vmatpush1.bf16.msra.mxu1 %v1608_v29  ;;  %1547 = vmatprep.subr.bf16.mxu0 %v1546_v30  ;;  %v1638_v30 = vpack.c.bf16 %v751_v28, %v750_v27 }
  0xbe   :  { %1611 = vmatprep.subr.bf16.mxu1 %v1610_v34  ;;  %v752_v34 = vld [vmem:[#allocation7 + $0xc0] sm:$0xff] }
  0xbf   :  { %v1642_v36 = vpack.c.bf16 %v753_v35, %v752_v34 }
  0xc0   :  { %1549 = vmatpush1.bf16.msra.mxu0 %v1548_v40  ;;  %v1644_v40 = vpack.c.bf16 %v737_v38, %v736_v37 }
  0xc1   :  { %1613 = vmatpush1.bf16.msra.mxu1 %v1612_v41  ;;  %1551 = vmatprep.subr.bf16.mxu0 %v1550_v42  ;;  %v755_v41 = vld [vmem:[#allocation7 + $0xd8] sm:$0xff] }
  0xc2   :  { %1615 = vmatprep.subr.bf16.mxu1 %v1614_v46  ;;  %v1646_v42 = vpack.c.bf16 %v755_v41, %v754_v39  ;;  %v756_v46 = vld [vmem:[#allocation7 + $0xe0] sm:$0xff] }
  0xc3   :  { %v1650_v48 = vpack.c.bf16 %v757_v47, %v756_v46 }
  0xc4   :  { %1553 = vmatpush1.bf16.msra.mxu0 %v1552_v52  ;;  %v758_v52 = vld [vmem:[#allocation7 + $0xf0] sm:$0xff] }
  0xc5   :  { %1617 = vmatpush1.bf16.msra.mxu1 %v1616_v16  ;;  %1555 = vmatprep.subr.bf16.mxu0 %v1554_v53  ;;  %v759_v16 = vld [vmem:[#allocation7 + $0xf8] sm:$0xff] }
  0xc6   :  { %1619 = vmatprep.subr.bf16.mxu1 %v1618_v57  ;;  %v1654_v53 = vpack.c.bf16 %v759_v16, %v758_v52  ;;  %v844_v57 = vld [vmem:[%s2197_s5] sm:$0xff] }
  0xc7   :  { %v1658_v60 = vpack.c.bf16 %v845_v58, %v844_v57 }
  0xc8   :  { %1557 = vmatpush1.bf16.msra.mxu0 %v1556_v63  ;;  %v848_v63 = vld [vmem:[%s2197_s5 + $0x20] sm:$0xff] }
  0xc9   :  { %1621 = vmatpush1.bf16.msra.mxu1 %v1620_v0  ;;  %1559 = vmatprep.subr.bf16.mxu0 %v1558_v1  ;;  %v849_v0 = vld [vmem:[%s2197_s5 + $0x28] sm:$0xff] }
  0xca   :  { %1623 = vmatprep.subr.bf16.mxu1 %v1622_v4  ;;  %v1666_v1 = vpack.c.bf16 %v849_v0, %v848_v63  ;;  %v1670_v4 = vpack.c.bf16 %v851_v3, %v850_v2 }
  0xcc   :  { %1561 = vmatpush1.bf16.msra.mxu0 %v1560_v7  ;;  %v1674_v7 = vpack.c.bf16 %v853_v6, %v852_v5 }
  0xcd   :  { %1625 = vmatpush1.bf16.msra.mxu1 %v1624_v8  ;;  %1627 = vmatprep.subr.bf16.mxu0 %v1626_v12  ;;  %v352_v8 = vlaneseq }
  0xce   :  { %1659 = vmatprep.subr.bf16.mxu1 %v1658_v60 }
  0xcf   :  { %611 = vmatmul.mubr.f32.vlgmr.msra.gmra.mrb[4].mxu0 %v2014_v15  ;;  %v353_v9 = vshrl.u32 %v352_v8, 7 }
  0xd0   :  { %688 = vmatmul.mubr.f32.vlgmr.msra.gmra.mrb[4].mxu1 %v2014_v15  ;;  %616 = vmatprep.mubr.f32.mxu0 %v2021_v13  ;;  %v748_v15 = vld [vmem:[#allocation7 + $0xa0] sm:$0xff] }
  0xd1   :  { %693 = vmatprep.mubr.f32.mxu1 %v2021_v13  ;;  %1629 = vmatpush3.bf16.msra.mxu0 %v1628_v20  ;;  %v1632_v13 = vpack.c.bf16 %v731_v23, %v730_v22  ;;  %v1634_v25 = vpack.c.bf16 %v749_v24, %v748_v15  ;;  %v354_v10 = vsub.s32 0, %v353_v9  ;;  %v362_v12 = vsub.s32 2, %v353_v9 }
  0xd2   :  { %1631 = vmatprep.subr.bf16.mxu0 %v1630_v21  ;;  %1661 = vmatpush3.bf16.msra.mxu1 %v1658_v60  ;;  %v358_v14 = vsub.s32 1, %v353_v9  ;;  %v366_v18 = vsub.s32 3, %v353_v9  ;;  %v378_v49 = vsub.s32 6, %v353_v9  ;;  %v374_v50 = vsub.s32 5, %v353_v9 }
  0xd3   :  { %617 = vmatmul.mubr.f32.gmra.mrb[6].mxu0 %v2027_v17  ;;  %1663 = vmatprep.subr.bf16.mxu1 %v1662_v62  ;;  %v355_v19 = vrot.slane %v350_v11, %v354_v10  ;;  %v363_v20 = vrot.slane %v350_v11, %v362_v12 }
  0xd4   :  { %694 = vmatmul.mubr.f32.gmra.mrb[6].mxu1 %v2027_v17  ;;  %v733_v17 = vld [vmem:[#allocation7 + $0x28] sm:$0xff]  ;;  %v359_v21 = vrot.slane %v350_v11, %v358_v14  ;;  %v367_v22 = vrot.slane %v350_v11, %v366_v18  ;;  %v379_v16 = vrot.slane %v350_v11, %v378_v49 }
  0xd5   :  { %1633 = vmatpush3.bf16.msra.mxu0 %v1632_v13  ;;  %v1636_v29 = vpack.c.bf16 %v733_v17, %v732_v26 }
  0xd6   :  { %1635 = vmatprep.subr.bf16.mxu0 %v1634_v25  ;;  %1665 = vmatpush3.bf16.msra.mxu1 %v1662_v62 }
  0xd7   :  { %1667 = vmatprep.subr.bf16.mxu1 %v1666_v1 }
  0xd9   :  { %1637 = vmatpush3.bf16.msra.mxu0 %v1636_v29 }
  0xda   :  { %1639 = vmatprep.subr.bf16.mxu0 %v1638_v30  ;;  %1669 = vmatpush3.bf16.msra.mxu1 %v1666_v1 }
  0xdb   :  { %1671 = vmatprep.subr.bf16.mxu1 %v1670_v4 }
  0xdd   :  { %1641 = vmatpush3.bf16.msra.mxu0 %v1640_v33 }
  0xde   :  { %1643 = vmatprep.subr.bf16.mxu0 %v1642_v36  ;;  %1673 = vmatpush3.bf16.msra.mxu1 %v1670_v4 }
  0xdf   :  { %1675 = vmatprep.subr.bf16.mxu1 %v1674_v7 }
  0xe1   :  { %1645 = vmatpush3.bf16.msra.mxu0 %v1644_v40 }
  0xe2   :  { %1647 = vmatprep.subr.bf16.mxu0 %v1646_v42  ;;  %1677 = vmatpush3.bf16.msra.mxu1 %v1674_v7 }
  0xe5   :  { %1649 = vmatpush3.bf16.msra.mxu0 %v1648_v45 }
  0xe6   :  { %1651 = vmatprep.subr.bf16.mxu0 %v1650_v48  ;;  %v370_v48 = vsub.s32 4, %v353_v9 }
  0xe8   :  { %v371_v52 = vrot.slane %v350_v11, %v370_v48 }
  0xe9   :  { %1653 = vmatpush3.bf16.msra.mxu0 %v1652_v51  ;;  %v382_v51 = vsub.s32 7, %v353_v9 }
  0xea   :  { %1655 = vmatprep.subr.bf16.mxu0 %v1654_v53  ;;  %v375_v53 = vrot.slane %v350_v11, %v374_v50 }
  0xeb   :  { %v383_v54 = vrot.slane %v350_v11, %v382_v51 }
  0xed   :  { %1657 = vmatpush3.bf16.msra.mxu0 %v1656_v56 }
 0x162   :  { %v458_v23 = vpop.f32.mrb[0].mxu0 }
 0x163   :  { %v459_v15 = vadd.f32 %v458_v23, %v355_v19  ;;  %v535_v24 = vpop.f32.mrb[0].mxu1  ;;  %v460_v13 = vpop.f32.mrb[1].mxu0 }
 0x164   :  { %v536_v25 = vadd.f32 %v535_v24, %v363_v20  ;;  %v461_v26 = vadd.f32 %v460_v13, %v359_v21  ;;  %v537_v17 = vpop.f32.mrb[1].mxu1 }
 0x165   :  { %v700_v27 = vmax.f32 %v459_v15, 0.0  ;;  %v538_v28 = vadd.f32 %v537_v17, %v367_v22  ;;  %v855_v17 = vld [vmem:[%s2197_s5 + $0x58] sm:$0xff] }
 0x166   :  { %v702_v29 = vmax.f32 %v536_v25, 0.0  ;;  %v701_v30 = vmax.f32 %v461_v26, 0.0  ;;  %v464_v34 = vpop.f32.mrb[2].mxu0  ;;  %v854_v26 = vld [vmem:[%s2197_s5 + $0x50] sm:$0xff] }
 0x167   :  { %v703_v31 = vmax.f32 %v538_v28, 0.0  ;;  %v541_v35 = vpop.f32.mrb[2].mxu1  ;;  %v465_v36 = vadd.f32 %v464_v34, %v355_v19  ;;  %v466_v38 = vpop.f32.mrb[3].mxu0  ;;  %v856_v28 = vld [vmem:[%s2197_s5 + $0x60] sm:$0xff] }
 0x168   :  { %v716_v32 = vmax.f32 %v700_v27, %v702_v29  ;;  %v542_v37 = vadd.f32 %v541_v35, %v363_v20  ;;  %v543_v39 = vpop.f32.mrb[3].mxu1  ;;  %v467_v40 = vadd.f32 %v466_v38, %v359_v21  ;;  %v1678_v27 = vpack.c.bf16 %v855_v17, %v854_v26  ;;  %v857_v29 = vld [vmem:[%s2197_s5 + $0x68] sm:$0xff]  ;;  %v944_v34 = vld [vmem:[%s2199_s7] sm:$0xff]  ;;  %v947_v38 = vld [vmem:[%s2199_s7 + $0x18] sm:$0xff] }
 0x169   :  { %v717_v33 = vmax.f32 %v701_v30, %v703_v31  ;;  %v544_v41 = vadd.f32 %v543_v39, %v367_v22  ;;  %v708_v42 = vmax.f32 %v465_v36, 0.0  ;;  %v1682_v30 = vpack.c.bf16 %v857_v29, %v856_v28  ;;  %v858_v31 = vld [vmem:[%s2197_s5 + $0x70] sm:$0xff]  ;;  %v945_v35 = vld [vmem:[%s2199_s7 + $0x8] sm:$0xff] }
 0x16a   :  { %v710_v43 = vmax.f32 %v542_v37, 0.0  ;;  %v709_v44 = vmax.f32 %v467_v40, 0.0  ;;  %1679 = vmatprep.subr.bf16.mxu1 %v1678_v27  ;;  %v946_v36 = vld [vmem:[%s2199_s7 + $0x10] sm:$0xff]  ;;  %v1690_v37 = vpack.c.bf16 %v945_v35, %v944_v34  ;;  %v948_v40 = vld [vmem:[%s2199_s7 + $0x20] sm:$0xff]  ;;  %v1193_v26 = vld [vmem:[#allocation8] ss:$0 sm:$0xff] }
 0x16b   :  { %v711_v45 = vmax.f32 %v544_v41, 0.0  ;;  %1681 = vmatpush3.bf16.msra.mxu1 %v1678_v27  ;;  %v1694_v39 = vpack.c.bf16 %v947_v38, %v946_v36  ;;  %v949_v41 = vld [vmem:[%s2199_s7 + $0x28] sm:$0xff] }
 0x16c   :  { %v718_v46 = vmax.f32 %v708_v42, %v710_v43  ;;  %1683 = vmatprep.subr.bf16.mxu1 %v1682_v30  ;;  %1691 = vmatprep.subr.bf16.mxu0 %v1690_v37  ;;  %v1698_v42 = vpack.c.bf16 %v949_v41, %v948_v40 }
 0x16d   :  { %v719_v47 = vmax.f32 %v709_v44, %v711_v45  ;;  %v1191_v44 = vld [vmem:[%s2196_s4] ss:$0 sm:$0xff] }
 0x16f   :  { %1685 = vmatpush3.bf16.msra.mxu1 %v1682_v30 }
 0x1a2   :  { %v612_v55 = vpop.f32.mrb[4].mxu0 }
 0x1a3   :  { %v613_v56 = vadd.f32 %v612_v55, %v371_v52  ;;  %v689_v57 = vpop.f32.mrb[4].mxu1  ;;  %v614_v58 = vpop.f32.mrb[5].mxu0 }
 0x1a4   :  { %v690_v59 = vadd.f32 %v689_v57, %v379_v16  ;;  %v615_v60 = vadd.f32 %v614_v58, %v375_v53  ;;  %v691_v61 = vpop.f32.mrb[5].mxu1  ;;  %v1044_v57 = vld [vmem:[%s2201_s9 + $0x8] sm:$0xff]  ;;  %v1045_v58 = vld [vmem:[%s2201_s9 + $0x10] sm:$0xff] }
 0x1a5   :  { %v704_v62 = vmax.f32 %v613_v56, 0.0  ;;  %v692_v63 = vadd.f32 %v691_v61, %v383_v54  ;;  %v1043_v56 = vld [vmem:[%s2201_s9] sm:$0xff] }
 0x1a6   :  { %v706_v0 = vmax.f32 %v690_v59, 0.0  ;;  %v705_v1 = vmax.f32 %v615_v60, 0.0  ;;  %v618_v2 = vpop.f32.mrb[6].mxu0  ;;  %v1706_v59 = vpack.c.bf16 %v1044_v57, %v1043_v56  ;;  %v1046_v60 = vld [vmem:[%s2201_s9 + $0x18] sm:$0xff] }
 0x1a7   :  { %v707_v3 = vmax.f32 %v692_v63, 0.0  ;;  %v619_v4 = vadd.f32 %v618_v2, %v371_v52  ;;  %v695_v5 = vpop.f32.mrb[6].mxu1  ;;  %v620_v6 = vpop.f32.mrb[7].mxu0  ;;  %v1710_v61 = vpack.c.bf16 %v1046_v60, %v1045_v58  ;;  %v1048_v63 = vld [vmem:[%s2201_s9 + $0x28] sm:$0xff]  ;;  %v1050_v2 = vld [vmem:[%s2201_s9 + $0x38] sm:$0xff] }
 0x1a8   :  { %v720_v7 = vmax.f32 %v704_v62, %v706_v0  ;;  %v696_v9 = vadd.f32 %v695_v5, %v379_v16  ;;  %v621_v10 = vadd.f32 %v620_v6, %v375_v53  ;;  %v697_v11 = vpop.f32.mrb[7].mxu1  ;;  %v950_v53 = vld [vmem:[%s2199_s7 + $0x30] sm:$0xff]  ;;  %v1047_v62 = vld [vmem:[%s2201_s9 + $0x20] sm:$0xff] }
 0x1a9   :  { %v721_v12 = vmax.f32 %v705_v1, %v707_v3  ;;  %v712_v14 = vmax.f32 %v619_v4, 0.0  ;;  %v698_v18 = vadd.f32 %v697_v11, %v383_v54  ;;  %v951_v54 = vld [vmem:[%s2199_s7 + $0x38] sm:$0xff]  ;;  %v1714_v0 = vpack.c.bf16 %v1048_v63, %v1047_v62  ;;  %v1049_v1 = vld [vmem:[%s2201_s9 + $0x30] sm:$0xff]  ;;  %v1192_v4 = vld [vmem:[%s2198_s6] ss:$0 sm:$0xff] }
 0x1aa   :  { %v724_v19 = vmax.f32 %v716_v32, %v720_v7  ;;  %v714_v20 = vmax.f32 %v696_v9, 0.0  ;;  %v713_v21 = vmax.f32 %v621_v10, 0.0  ;;  %v859_v32 = vld [vmem:[%s2197_s5 + $0x78] sm:$0xff]  ;;  %v1702_v55 = vpack.c.bf16 %v951_v54, %v950_v53 }
 0x1ab   :  { %v715_v22 = vmax.f32 %v698_v18, 0.0  ;;  %v725_v23 = vmax.f32 %v717_v33, %v721_v12  ;;  %v1686_v33 = vpack.c.bf16 %v859_v32, %v858_v31  ;;  %v1718_v3 = vpack.c.bf16 %v1050_v2, %v1049_v1  ;;  %v1051_v12 = vld [vmem:[%s2201_s9 + $0x40] sm:$0xff] }
 0x1ac   :  { %v722_v15 = vmax.f32 %v712_v14, %v714_v20  ;;  %v1052_v14 = vld [vmem:[%s2201_s9 + $0x48] sm:$0xff]  ;;  %v1054_v20 = vld [vmem:[%s2201_s9 + $0x58] sm:$0xff]  ;;  %v1142_v32 = vand.u32 127, %v352_v8 }
 0x1ad   :  { %v723_v24 = vmax.f32 %v713_v21, %v715_v22  ;;  %831 = vmatprep.mubr.f32.mxu0 %v725_v23  ;;  %1687 = vmatprep.subr.bf16.mxu1 %v1686_v33  ;;  %v1722_v18 = vpack.c.bf16 %v1052_v14, %v1051_v12  ;;  %v1055_v22 = vld [vmem:[%s2201_s9 + $0x60] sm:$0xff]  ;;  %v1056_v23 = vld [vmem:[%s2201_s9 + $0x68] sm:$0xff] }
 0x1ae   :  { %832 = vmatmul.mubr.f32.vlgmr.msra.gmra.mrb[8].mxu0 %v724_v19  ;;  %v726_v13 = vmax.f32 %v718_v46, %v722_v15  ;;  %1689 = vmatpush3.bf16.msra.mxu1 %v1686_v33  ;;  %v1053_v19 = vld [vmem:[%s2201_s9 + $0x50] sm:$0xff]  ;;  %v1196_v33 = vld [vmem:[%s2202_s10] ss:$0 sm:$0xff]  ;;  %vm1143_vm1 = vcmp.lt.s32.totalorder %v1142_v32, 7  ;;  %s1885_s10 = smov [#allocation10]  }
 0x1af   :  { %v727_v25 = vmax.f32 %v719_v47, %v723_v24  ;;  %1693 = vmatpush3.bf16.msra.mxu0 %v1690_v37  ;;  %1707 = vmatprep.subr.bf16.mxu1 %v1706_v59  ;;  %v1726_v21 = vpack.c.bf16 %v1054_v20, %v1053_v19  ;;  %v1057_v15 = vld [vmem:[%s2201_s9 + $0x70] sm:$0xff]  ;;  %v1730_v24 = vpack.c.bf16 %v1056_v23, %v1055_v22  ;;  %s1177_s25 = sshll.u32 %s1885_s10, 4  ;;  %s1178_s25 = int_to_ptr.vmem [resolvable:$true] %s1177_s25 }
 0x1b0   :  { %1695 = vmatprep.subr.bf16.mxu0 %v1694_v39  ;;  %s1847_s28 = scalar_lea.vmem %s1178_s25, 256  ;;  %p1852_p5 = scmp.lt.s32.totalorder %s1178_s25, %s1178_s25 }
 0x1b1   :  { %836 = vmatprep.mubr.f32.mxu0 %v727_v25  ;;  %p1848_p4 = scmp.ne.s32.totalorder %s1178_s25, %s1847_s28  ;;  %p1853_p6 = scmp.lt.s32.totalorder %s1847_s28, %s1847_s28 }
 0x1b2   :  { %837 = vmatmul.mubr.f32.gmra.mrb[10].mxu0 %v726_v13  ;;  %v1058_v13 = vld [vmem:[%s2201_s9 + $0x78] sm:$0xff] }
 0x1b3   :  { %1697 = vmatpush3.bf16.msra.mxu0 %v1694_v39  ;;  %v1734_v25 = vpack.c.bf16 %v1058_v13, %v1057_v15  ;;  %p1854_p7 = por %p1853_p6, %p1852_p5 }
 0x1b4   :  { %1699 = vmatprep.subr.bf16.mxu0 %v1698_v42 }
 0x1b5   :  { %p1855_p8 = pnand %p1854_p7, %p1848_p4 }
 0x1b7   :  { %1701 = vmatpush3.bf16.msra.mxu0 %v1698_v42 }
 0x1b8   :  { %1703 = vmatprep.subr.bf16.mxu0 %v1702_v55 }
 0x1bb   :  { %1705 = vmatpush3.bf16.msra.mxu0 %v1702_v55 }
 0x281   :  { %v1229_v43 = vpop.f32.mrb[8].mxu0 }
 0x282   :  { %v1230_v45 = vpop.f32.mrb[9].mxu0 }
 0x283   :  { %v1231_v46 = vadd.f32 %v1230_v45, %v1229_v43 }
 0x285   :  { %v834_v47 = vadd.f32 %v1231_v46, %v1191_v44  ;;  %v1232_v48 = vpop.f32.mrb[10].mxu0 }
 0x286   :  { %v1233_v49 = vpop.f32.mrb[11].mxu0 }
 0x287   :  { %v842_v50 = vmax.f32 %v834_v47, 0.0  ;;  %v1234_v51 = vadd.f32 %v1233_v49, %v1232_v48 }
 0x289   :  { %v839_v52 = vadd.f32 %v1234_v51, %v1191_v44  ;;  %1313 = vmatprep.mubr.f32.mxu1 %v842_v50 }
 0x28b   :  { %v843_v16 = vmax.f32 %v839_v52, 0.0 }
 0x28d   :  { %1314 = vmatmul.mubr.f32.vlgmr.msra.gmra.mrb[8].mxu1 %v843_v16 }
 0x28e   :  { %1709 = vmatpush3.bf16.msra.mxu1 %v1706_v59 }
 0x28f   :  { %1711 = vmatprep.subr.bf16.mxu1 %v1710_v61 }
 0x292   :  { %1713 = vmatpush3.bf16.msra.mxu1 %v1710_v61 }
 0x293   :  { %1715 = vmatprep.subr.bf16.mxu1 %v1714_v0 }
 0x296   :  { %1717 = vmatpush3.bf16.msra.mxu1 %v1714_v0 }
 0x297   :  { %1719 = vmatprep.subr.bf16.mxu1 %v1718_v3 }
 0x29a   :  { %1721 = vmatpush3.bf16.msra.mxu1 %v1718_v3 }
 0x29b   :  { %1723 = vmatprep.subr.bf16.mxu1 %v1722_v18 }
 0x29e   :  { %1725 = vmatpush3.bf16.msra.mxu1 %v1722_v18 }
 0x29f   :  { %1727 = vmatprep.subr.bf16.mxu1 %v1726_v21 }
 0x2a2   :  { %1729 = vmatpush3.bf16.msra.mxu1 %v1726_v21 }
 0x2a3   :  { %1731 = vmatprep.subr.bf16.mxu1 %v1730_v24 }
 0x2a6   :  { %1733 = vmatpush3.bf16.msra.mxu1 %v1730_v24 }
 0x2a7   :  { %1735 = vmatprep.subr.bf16.mxu1 %v1734_v25 }
 0x2aa   :  { %1737 = vmatpush3.bf16.msra.mxu1 %v1734_v25 }
 0x360   :  { %v1315_v5 = vpop.f32.mrb[8].mxu1 }
 0x361   :  { %v939_v6 = vadd.f32 %v1315_v5, %v1192_v4  ;;  %v933_v7 = vpop.f32.mrb[9].mxu1 }
 0x362   :  { %v934_v9 = vadd.f32 %v1192_v4, %v933_v7 }
 0x363   :  { %v943_v11 = vmax.f32 %v939_v6, 0.0 }
 0x364   :  { %v942_v10 = vmax.f32 %v934_v9, 0.0 }
 0x366   :  { %1332 = vmatprep.mubr.msk.f32.mxu0 %vm959_vm0, %v942_v10 }
 0x367   :  { %1333 = vmatmul.mubr.msk.f32.vlgmr.msra.gmra.mrb[12].mxu0 %vm959_vm0, %v943_v11 }
 0x43a   :  { %v1334_v17 = vpop.f32.mrb[12].mxu0 }
 0x43b   :  { %v1038_v27 = vadd.f32 %v1334_v17, %v1193_v26  ;;  %v1032_v28 = vpop.f32.mrb[13].mxu0 }
 0x43c   :  { %v1033_v29 = vadd.f32 %v1193_v26, %v1032_v28 }
 0x43e   :  { %1747 = vtanh.f32 %v1033_v29 }
 0x43f   :  { %1749 = vtanh.f32 %v1038_v27 }
 0x448   :  { %v1748_v30 = vpop.eup %1747 }
 0x449   :  { %v1750_v31 = vpop.eup %1749  ;;  %1367 = vmatprep.mubr.f32.mxu1 %v1748_v30 }
 0x44a   :  { %1368 = vmatmul.mubr.f32.vlgmr.msra.gmra.mrb[10].mxu1 %v1750_v31 }
 0x51d   :  { %v1369_v34 = vpop.f32.mrb[10].mxu1 }
 0x51e   :  { %v1132_v35 = vpop.f32.mrb[11].mxu1  ;;  %v1138_v37 = vadd.f32 %v1369_v34, %v1196_v33 }
 0x51f   :  { %v1133_v36 = vadd.f32 %v1196_v33, %v1132_v35 }
 0x520   :  { %v1145_v39 = vsel %vm1143_vm1, %v1138_v37, -inf }
 0x521   :  { %v1144_v38 = vsel %vm1143_vm1, %v1133_v36, -inf }
 0x522   :  { %1146 = vmax.xlane.f32.xlu0 %v1144_v38 }
 0x526   :  { %1148 = vmax.xlane.f32.xlu0 %v1145_v39 }
 0x5af   :  { %v1147_v40 = vpop.xlane.xlu0 %1146 }
 0x5b0   :  { %v1150_v41 = vsub.f32 %v1133_v36, %v1147_v40 }
 0x5b2   :  { %v1152_v42 = vmul.f32 1.442695, %v1150_v41 }
 0x5b3   :  { %v1149_v43 = vpop.xlane.xlu0 %1148 }
 0x5b4   :  { %1751 = vpow2.f32 %v1152_v42  ;;  %v1151_v8 = vsub.f32 %v1138_v37, %v1149_v43 }
 0x5b6   :  { %v1154_v44 = vmul.f32 1.442695, %v1151_v8 }
 0x5b8   :  { %1753 = vpow2.f32 %v1154_v44 }
 0x5be   :  { %v1752_v45 = vpop.eup %1751 }
 0x5bf   :  { %v1156_v46 = vsel %vm1143_vm1, %v1752_v45, 0.0 }
 0x5c0   :  { %1158 = vadd.xlane.f32.xlu1 %v1156_v46 }
 0x5c2   :  { %v1754_v47 = vpop.eup %1753 }
 0x5c3   :  { %v1157_v48 = vsel %vm1143_vm1, %v1754_v47, 0.0 }
 0x5c4   :  { %1160 = vadd.xlane.f32.xlu1 %v1157_v48 }
 0x64d   :  { %v1159_v49 = vpop.xlane.xlu1 %1158 }
 0x64e   :  { %1755 = vlog2.f32 %v1159_v49 }
 0x651   :  { %v1161_v50 = vpop.xlane.xlu1 %1160 }
 0x652   :  { %1757 = vlog2.f32 %v1161_v50 }
 0x658   :  { %v1756_v51 = vpop.eup %1755 }
 0x659   :  { %v1163_v52 = vmul.f32 0.6931472, %v1756_v51 }
 0x65b   :  { %v1166_v16 = vsub.f32 %v1150_v41, %v1163_v52 }
 0x65c   :  { %v1758_v53 = vpop.eup %1757 }
 0x65d   :  { %v1165_v54 = vmul.f32 0.6931472, %v1758_v53  ;;  %v1168_v55 = vsel %vm1143_vm1, %v1166_v16, %v1133_v36 }
 0x65e   :  { %1170 = vst [vmem:[#allocation10] sm:$0xff] %v1168_v55 }
 0x65f   :  { %v1167_v56 = vsub.f32 %v1151_v8, %v1165_v54 }
 0x661   :  { %v1169_v57 = vsel %vm1143_vm1, %v1167_v56, %v1138_v37 }
 0x662   :  { %1171 = vst [vmem:[#allocation10 + $0x8] sm:$0xff] %v1169_v57 }
 0x663   :  { %1858 = shalt.err (!%p1855_p8)
}
 0x664   :  { %s1859_s30 = scalar_lea.hbm %s2203_s11, 256 }
 0x665   :  { %p1860_p9 = scmp.ne.s32.totalorder %s2203_s11, %s1859_s30  ;;  %p1863_p10 = scmp.lt.u32.totalorder %s1859_s30, %s2203_s11 }
 0x667   :  { %p1865_p11 = pnand %p1863_p10, %p1860_p9 }
 0x669   :  { %1868 = shalt.err (!%p1865_p11)
}
 0x66a   :  { %1183 = dma.vmem_to_hbm [thread:$0]  %s1178_s25, 256, %s2203_s11, [#allocation4], %s1882_s1, %s1882_s1, %s1883_s20  }
 0x66b   :  { %1875 = dma.done.wait [#allocation4], 256  }
 0x66c   :  { %1876 = vsyncadd [#allocation4], 4294967040 }
 0x66d   :  { %1187 = vsyncpa [#allocation3], 1 }
 0x66e   :  { %1188 = vsyncpa [#allocation6], 1 }
 0x66f   :  { %1189 = vsyncpa [#allocation9], 1 }
 0x670   :  { %1190 = vsyncpa [#allocation4], 1 }

</bundles_post_ra>
